<compile_context>
chip_gen: v7x
topology: tpu7x:2x2x1
jax: 0.10.0
libtpu: 0.0.40
codegen_flags: <defaults>
</compile_context>

<pallas_src>
import functools

import jax
import jax.numpy as jnp
import numpy as np
from jax.experimental import pallas as pl
from jax.experimental.pallas import tpu as pltpu

LANE = 128


def _round_up(x, m):
    return ((x + m - 1) // m) * m


@functools.lru_cache(maxsize=None)
def _vmem_limit_bytes():
    """Generation-aware scoped-VMEM limit (leave headroom for double buffers)."""
    cap = None
    try:
        cap = getattr(pltpu.get_tpu_info(), "vmem_capacity_bytes", None)
    except Exception:
        cap = None
    if not cap:
        return 64 * 1024 * 1024                       # conservative fallback
    # v7x (64 MiB physical)  -> 48 MiB;  v5e/v6e (128 MiB) -> 96 MiB.
    return int(min(cap - 16 * 1024 * 1024, 0.75 * cap))


def _choose_m_tile(M):
    """Row tile for the batched matmuls (M = T*B)."""
    m8 = _round_up(max(M, 1), 8)
    tm = m8 if m8 <= 512 else 256
    m_pad = _round_up(m8, tm)
    return tm, m_pad


def _pad_rows(x, m_pad):
    M = x.shape[0]
    if m_pad == M:
        return x
    return jnp.pad(x, ((0, m_pad - M),) + ((0, 0),) * (x.ndim - 1))


# ---------------------------------------------------------------------------
# Generic tiled matmul + bias kernel (used for gates_ih precompute and the
# batched vocab projection).  Full K per block, lane-dense N tiles, both grid
# axes "parallel" (megacore-shardable on v7x).
# ---------------------------------------------------------------------------
def matmul_bias_kernel(x_ref, w_ref, b_ref, o_ref):
    o_ref[...] = (
        jnp.dot(x_ref[...], w_ref[...], preferred_element_type=jnp.float32)
        + b_ref[...]
    ).astype(o_ref.dtype)


def matmul_bias(x, w, b, *, tm, tn, out_dtype=jnp.float32):
    """x: (M, K), w: (K, N), b: (1, N) -> (M, N).  M % tm == 0, N % tn == 0."""
    M, K = x.shape
    _, N = w.shape
    assert M % tm == 0 and N % tn == 0
    cost = pl.CostEstimate(
        flops=2 * M * K * N,
        transcendentals=0,
        bytes_accessed=(M * K * x.dtype.itemsize + K * N * w.dtype.itemsize
                        + N * 4 + M * N * jnp.dtype(out_dtype).itemsize),
    )
    return pl.pallas_call(
        matmul_bias_kernel,
        out_shape=jax.ShapeDtypeStruct((M, N), out_dtype),
        grid=(M // tm, N // tn),
        in_specs=[
            pl.BlockSpec((tm, K), lambda i, j: (i, 0)),
            pl.BlockSpec((K, tn), lambda i, j: (0, j)),
            pl.BlockSpec((1, tn), lambda i, j: (0, j)),
        ],
        out_specs=pl.BlockSpec((tm, tn), lambda i, j: (i, j)),
        compiler_params=pltpu.CompilerParams(
            dimension_semantics=("parallel", "parallel"),
            vmem_limit_bytes=_vmem_limit_bytes(),
        ),
        cost_estimate=cost,
    )(x, w, b)


# ---------------------------------------------------------------------------
# Phase 1: T-step LSTM recurrence kernel (grid over time only).
# ---------------------------------------------------------------------------
def lstm_seq_kernel(
    gih_ref,      # (T, B, 4H)  f32   gates_ih = emb @ W_ih^T + b (resident)
    h0_ref,       # (B, H)      f32   initial hidden state (resident)
    c0_ref,       # (B, H)      f32   initial cell state (resident)
    w_hh_ref,     # (H, 4H)     bf16  W_hh^T (resident)
    h_out_ref,    # (1, B, H)   f32   out: h_t
    c_out_ref,    # (1, B, H)   f32   out: c_t
    hbf_out_ref,  # (1, B, H)   bf16  out: bf16(h_t) (consumed by phase 2)
    c_sc,         # (B, H)      f32   VMEM scratch (cell carry)
    hbf_sc,       # (B, H)      bf16  VMEM scratch (bf16 hidden carry)
):
    t = pl.program_id(0)
    H = c_sc.shape[1]

    @pl.when(t == 0)
    def _init():
        c_sc[...] = c0_ref[...]
        hbf_sc[...] = h0_ref[...].astype(jnp.bfloat16)

    # gates = gates_ih[t] + h_{t-1} @ W_hh^T   (bf16 operands, f32 accumulate)
    gates = gih_ref[t] + jnp.dot(hbf_sc[...], w_hh_ref[...],
                                 preferred_element_type=jnp.float32)

    # PyTorch gate order: input, forget, cell(g), output.
    # H % 128 == 0 -> gate slices are lane-tile aligned (free).
    i_g = jax.nn.sigmoid(gates[:, 0 * H:1 * H])
    f_g = jax.nn.sigmoid(gates[:, 1 * H:2 * H])
    g_g = jnp.tanh(gates[:, 2 * H:3 * H])
    o_g = jax.nn.sigmoid(gates[:, 3 * H:4 * H])

    c_new = f_g * c_sc[...] + i_g * g_g
    h_new = o_g * jnp.tanh(c_new)
    h_bf = h_new.astype(jnp.bfloat16)          # single cast, reused twice

    c_sc[...] = c_new
    hbf_sc[...] = h_bf

    h_out_ref[0] = h_new
    c_out_ref[0] = c_new
    hbf_out_ref[0] = h_bf


def lstm_recurrence(prepped, gih, h0, c0):
    T, B, _ = gih.shape
    H = prepped["H"]
    cost = pl.CostEstimate(
        flops=T * (2 * B * H * 4 * H + 10 * B * H),
        transcendentals=T * B * 5 * H,
        bytes_accessed=(T * B * 4 * H * 4 + H * 4 * H * 2 + 2 * B * H * 4
                        + T * B * H * (4 + 4 + 2)),
    )
    return pl.pallas_call(
        lstm_seq_kernel,
        out_shape=(
            jax.ShapeDtypeStruct((T, B, H), jnp.float32),
            jax.ShapeDtypeStruct((T, B, H), jnp.float32),
            jax.ShapeDtypeStruct((T, B, H), jnp.bfloat16),
        ),
        grid=(T,),
        in_specs=[
            # gates_ih for the whole sequence is tiny (T*B*4H*4 bytes) — keep
            # it resident instead of T per-step DMAs.
            pl.BlockSpec((T, B, 4 * H), lambda t: (0, 0, 0)),
            pl.BlockSpec((B, H), lambda t: (0, 0)),
            pl.BlockSpec((B, H), lambda t: (0, 0)),
            pl.BlockSpec((H, 4 * H), lambda t: (0, 0)),
        ],
        out_specs=(
            pl.BlockSpec((1, B, H), lambda t: (t, 0, 0)),
            pl.BlockSpec((1, B, H), lambda t: (t, 0, 0)),
            pl.BlockSpec((1, B, H), lambda t: (t, 0, 0)),
        ),
        scratch_shapes=[
            pltpu.VMEM((B, H), jnp.float32),       # c carry
            pltpu.VMEM((B, H), jnp.bfloat16),      # bf16 h carry
        ],
        compiler_params=pltpu.CompilerParams(
            dimension_semantics=("arbitrary",),    # time axis carries state
            vmem_limit_bytes=_vmem_limit_bytes(),
        ),
        cost_estimate=cost,
    )(gih, h0, c0, prepped["w_hh_t"])


# ---------------------------------------------------------------------------
# One-time parameter preparation (outside the hot path)
# ---------------------------------------------------------------------------
def prepare_params(params):
    """Transpose / fuse / pad / cast weights once, before the decode loop."""
    H = params["w_hh"].shape[1]
    E = params["emb"].shape[1]
    V = params["fc_w"].shape[0]
    assert H % LANE == 0, "decoder_dim must be a multiple of 128 (lane-aligned gates)"

    emb_bf = params["emb"].astype(jnp.bfloat16)                       # (V, E)
    w_ih_t = params["w_ih"].T.astype(jnp.bfloat16)                    # (E, 4H)
    w_hh_t = params["w_hh"].T.astype(jnp.bfloat16)                    # (H, 4H)
    b_gates = (params["b_ih"] + params["b_hh"]).reshape(1, 4 * H)
    b_gates = b_gates.astype(jnp.float32)

    # fc weight: transpose once, zero-pad the vocab axis to a lane-dense tile
    # (handles vocab sizes that are not multiples of 128).
    tn_fc = min(2048, _round_up(V, LANE))
    V_pad = _round_up(V, tn_fc)
    w_fc_t = jnp.zeros((H, V_pad), jnp.float32).at[:, :V].set(params["fc_w"].T)
    w_fc_t = w_fc_t.astype(jnp.bfloat16)
    b_fc = jnp.zeros((1, V_pad), jnp.float32).at[0, :V].set(params["fc_b"])

    n4h = 4 * H
    tn_gates = n4h if n4h <= 4096 else (2048 if n4h % 2048 == 0 else 512)

    return {
        "emb_bf": emb_bf, "w_ih_t": w_ih_t, "w_hh_t": w_hh_t,
        "b_gates": b_gates, "w_fc_t": w_fc_t, "b_fc": b_fc,
        "E": E, "H": H, "V": V, "V_pad": V_pad,
        "tn_fc": tn_fc, "tn_gates": tn_gates,
    }


# ---------------------------------------------------------------------------
# Multi-step decode: phase 0 (hoisted ih-projection) -> phase 1 (recurrence)
# -> phase 2 (batched vocab projection).
# ---------------------------------------------------------------------------
def decoder_forward_sequence(prepped, words, h0, c0, scores_dtype=jnp.float32):
    """words: (T, B) int32; h0/c0: (B, H) f32.

    Returns (scores (T,B,V), h_seq (T,B,H) f32, c_seq (T,B,H) f32), i.e. the
    original module's forward applied at every step t with the recurrent
    state threaded through.  scores_dtype=jnp.bfloat16 halves the dominant
    HBM writeback if the consumer (argmax/beam) tolerates it.
    """
    T, B = words.shape
    H, V = prepped["H"], prepped["V"]
    M = T * B

    # ---- Phase 0: embedding lookup + batched input-to-hidden projection ----
    # Note: batch sizes >= 16 fill bf16 sublane packing / MXU rows better.
    emb_seq = jnp.take(prepped["emb_bf"], words.reshape(-1), axis=0)  # (M, E)
    tm, m_pad = _choose_m_tile(M)
    gih = matmul_bias(_pad_rows(emb_seq, m_pad),
                      prepped["w_ih_t"], prepped["b_gates"],
                      tm=tm, tn=prepped["tn_gates"])
    gih = gih[:M].reshape(T, B, 4 * H)

    # ---- Phase 1: sequential LSTM recurrence (grid over time only) ----
    # Dropout: identity (inference / model.eval()).
    # TODO(synk): training-mode dropout would use pltpu.prng_seed +
    #             pltpu.stateful_bernoulli on h before the projection.
    h_seq, c_seq, hbf_seq = lstm_recurrence(prepped, gih, h0, c0)

    # ---- Phase 2: batched vocab projection, fc weight read once total ----
    scores_flat = matmul_bias(_pad_rows(hbf_seq.reshape(M, H), m_pad),
                              prepped["w_fc_t"], prepped["b_fc"],
                              tm=tm, tn=prepped["tn_fc"],
                              out_dtype=scores_dtype)
    scores = scores_flat[:M, :V].reshape(T, B, V)
    return scores, h_seq, c_seq


def decoder_forward(prepped, word, h_prev, c_prev):
    """Single-step forward matching the PyTorch module signature
    (word (B,), h (B,H), c (B,H)) -> (scores (B,V), h (B,H), c (B,H))."""
    scores, h_seq, c_seq = decoder_forward_sequence(
        prepped, word[None, :], h_prev, c_prev)
    return scores[0], h_seq[0], c_seq[0]


def init_hidden_state(params, encoder_out):
    """Mirrors Decoder.init_hidden_state (plain-JAX glue, not the hot path)."""
    mean_enc = encoder_out.mean(axis=1)                   # (B, encoder_dim)
    h = mean_enc @ params["init_h_w"].T + params["init_h_b"]
    c = mean_enc @ params["init_c_w"].T + params["init_c_b"]
    return h, c


# ---------------------------------------------------------------------------
# Pure-JAX reference (mirrors the kernel's bf16 rounding of matmul operands)
# ---------------------------------------------------------------------------
def reference_sequence(prepped, words, h0, c0):
    f32 = lambda x: x.astype(jnp.float32)
    V, H = prepped["V"], prepped["H"]
    emb_tab = f32(prepped["emb_bf"])
    w_ih = f32(prepped["w_ih_t"])
    w_hh = f32(prepped["w_hh_t"])
    w_fc = f32(prepped["w_fc_t"])[:, :V]
    b_g = prepped["b_gates"]
    b_fc = prepped["b_fc"][:, :V]
    T = words.shape[0]
    h, c = h0, c0
    scores_all, h_all, c_all = [], [], []
    for t in range(T):
        emb = emb_tab[words[t]]                            # (B, E)
        h_bf = h.astype(jnp.bfloat16).astype(jnp.float32)
        gates = emb @ w_ih + b_g + h_bf @ w_hh
        i_g = jax.nn.sigmoid(gates[:, 0 * H:1 * H])
        f_g = jax.nn.sigmoid(gates[:, 1 * H:2 * H])
        g_g = jnp.tanh(gates[:, 2 * H:3 * H])
        o_g = jax.nn.sigmoid(gates[:, 3 * H:4 * H])
        c = f_g * c + i_g * g_g
        h = o_g * jnp.tanh(c)
        s = h.astype(jnp.bfloat16).astype(jnp.float32) @ w_fc + b_fc
        scores_all.append(s)
        h_all.append(h)
        c_all.append(c)
    return jnp.stack(scores_all), jnp.stack(h_all), jnp.stack(c_all)


# ---------------------------------------------------------------------------
# Deterministic parameter construction (shapes follow Decoder.__init__)
# ---------------------------------------------------------------------------
def make_params(key, *, decoder_dim, embed_dim, vocab_size, encoder_dim):
    ks = jax.random.split(key, 10)
    u = lambda k, shape, lim: jax.random.uniform(k, shape, jnp.float32, -lim, lim)
    H, E, V, C = decoder_dim, embed_dim, vocab_size, encoder_dim
    lstm_lim = 1.0 / (H ** 0.5)
    lin_lim_enc = 1.0 / (C ** 0.5)
    return {
        # nn.Embedding(vocab_size, embed_dim): uniform(-0.1, 0.1)
        "emb": u(ks[0], (V, E), 0.1),
        # nn.LSTMCell(embed_dim, decoder_dim)
        "w_ih": u(ks[1], (4 * H, E), lstm_lim),
        "w_hh": u(ks[2], (4 * H, H), lstm_lim),
        "b_ih": u(ks[3], (4 * H,), lstm_lim),
        "b_hh": u(ks[4], (4 * H,), lstm_lim),
        # nn.Linear(encoder_dim, decoder_dim) x2
        "init_h_w": u(ks[5], (H, C), lin_lim_enc),
        "init_h_b": u(ks[6], (H,), lin_lim_enc),
        "init_c_w": u(ks[7], (H, C), lin_lim_enc),
        "init_c_b": u(ks[8], (H,), lin_lim_enc),
        # nn.Linear(decoder_dim, vocab_size): Decoder.init_weights ->
        # weight uniform(-0.1, 0.1), bias filled with 0.
        "fc_w": u(ks[9], (V, H), 0.1),
        "fc_b": jnp.zeros((V,), jnp.float32),
    }


if __name__ == "__main__":
    # Small, TPU-friendly shapes (H lane-aligned; vocab deliberately NOT a
    # multiple of 128 to exercise the vocab-padding path).
    B = 8             # batch
    T = 8             # decode steps
    embed_dim = 32
    decoder_dim = 128
    vocab_size = 250
    encoder_dim = 512
    num_pixels = 16   # encoder spatial positions (e.g. 4x4 feature map)

    key = jax.random.PRNGKey(0)
    k_params, k_word, k_enc = jax.random.split(key, 3)

    params = make_params(
        k_params,
        decoder_dim=decoder_dim,
        embed_dim=embed_dim,
        vocab_size=vocab_size,
        encoder_dim=encoder_dim,
    )
    prepped = prepare_params(params)

    words = jax.random.randint(k_word, (T, B), 0, vocab_size, dtype=jnp.int32)
    encoder_out = jax.random.normal(
        k_enc, (B, num_pixels, encoder_dim), jnp.float32)

    # h0, c0 as produced by Decoder.init_hidden_state
    h0, c0 = init_hidden_state(params, encoder_out)

    # Multi-step decode (recurrence kernel + batched projection kernels).
    seq_fwd = jax.jit(functools.partial(decoder_forward_sequence, prepped))
    scores, h_seq, c_seq = seq_fwd(words, h0, c0)
    jax.block_until_ready((scores, h_seq, c_seq))

    assert scores.shape == (T, B, vocab_size)
    assert h_seq.shape == (T, B, decoder_dim)
    assert c_seq.shape == (T, B, decoder_dim)

    # Correctness vs. a pure-JAX reference that mirrors the bf16 rounding.
    ref_scores, ref_h, ref_c = reference_sequence(prepped, words, h0, c0)
    np.testing.assert_allclose(np.asarray(scores), np.asarray(ref_scores),
                               atol=2e-2, rtol=2e-2)
    np.testing.assert_allclose(np.asarray(h_seq), np.asarray(ref_h),
                               atol=2e-2, rtol=2e-2)
    np.testing.assert_allclose(np.asarray(c_seq), np.asarray(ref_c),
                               atol=2e-2, rtol=2e-2)

    # Single-step path (matches the PyTorch module forward signature).
    step_fwd = jax.jit(functools.partial(decoder_forward, prepped))
    s1, h1, c1 = step_fwd(words[0], h0, c0)
    jax.block_until_ready((s1, h1, c1))
    assert s1.shape == (B, vocab_size)
    np.testing.assert_allclose(np.asarray(s1), np.asarray(scores[0]),
                               atol=1e-4, rtol=1e-4)
    np.testing.assert_allclose(np.asarray(h1), np.asarray(h_seq[0]),
                               atol=1e-4, rtol=1e-4)

    print("KERNEL_OK")
</pallas_src>

<mosaic_0001>
module attributes {stable_mosaic.version = 11 : i64} {
  func.func @matmul_bias_kernel(%arg0: i32, %arg1: i32, %arg2: memref<64x32xbf16, #tpu.memory_space<vmem>>, %arg3: memref<32x512xbf16, #tpu.memory_space<vmem>>, %arg4: memref<1x512xf32, #tpu.memory_space<vmem>>, %arg5: memref<64x512xf32, #tpu.memory_space<vmem>>) attributes {dimension_semantics = [#tpu.dimension_semantics<parallel>, #tpu.dimension_semantics<parallel>], iteration_bounds = array<i64: 1, 1>, scalar_prefetch = 0 : i64, scratch_operands = 0 : i64, tpu.core_type = #tpu.core_type<tc>, window_params = [{transform_indices = @transform_0, window_bounds = array<i64: 64, 32>}, {transform_indices = @transform_1, window_bounds = array<i64: 32, 512>}, {transform_indices = @transform_2, window_bounds = array<i64: 1, 512>}, {transform_indices = @transform_3, window_bounds = array<i64: 64, 512>}]} {
    %c0 = arith.constant 0 : index
    %c0_0 = arith.constant 0 : index
    %0 = vector.load %arg2[%c0, %c0_0] : memref<64x32xbf16, #tpu.memory_space<vmem>>, vector<64x32xbf16>
    %c0_1 = arith.constant 0 : index
    %c0_2 = arith.constant 0 : index
    %1 = vector.load %arg3[%c0_1, %c0_2] : memref<32x512xbf16, #tpu.memory_space<vmem>>, vector<32x512xbf16>
    %cst = arith.constant dense<0.000000e+00> : vector<64x512xf32>
    %2 = tpu.matmul %0, %1, %cst {dimension_numbers = #tpu.dot_dimension_numbers<[1], [0], [0], [1], [0, 0, 1, 1], [], []>} : vector<64x32xbf16>, vector<32x512xbf16>, vector<64x512xf32> -> vector<64x512xf32>
    %c0_3 = arith.constant 0 : index
    %c0_4 = arith.constant 0 : index
    %3 = vector.load %arg4[%c0_3, %c0_4] : memref<1x512xf32, #tpu.memory_space<vmem>>, vector<1x512xf32>
    %4 = vector.broadcast %3 : vector<1x512xf32> to vector<64x512xf32>
    %5 = arith.addf %2, %4 : vector<64x512xf32>
    %c0_5 = arith.constant 0 : index
    %c0_6 = arith.constant 0 : index
    %6 = vector.load %arg5[%c0_5, %c0_6] : memref<64x512xf32, #tpu.memory_space<vmem>>, vector<64x512xf32>
    tpu.vector_store %arg5[%c0_5, %c0_6], %5 {strides = array<i32>} : memref<64x512xf32, #tpu.memory_space<vmem>>, vector<64x512xf32>,
    return
  }
  func.func @transform_0(%arg0: i32, %arg1: i32) -> (i32, i32) {
    %c0_i32 = arith.constant 0 : i32
    %c0_i32_0 = arith.constant 0 : i32
    return %arg0, %c0_i32 : i32, i32
  }
  func.func @transform_1(%arg0: i32, %arg1: i32) -> (i32, i32) {
    %c0_i32 = arith.constant 0 : i32
    %c0_i32_0 = arith.constant 0 : i32
    return %c0_i32, %arg1 : i32, i32
  }
  func.func @transform_2(%arg0: i32, %arg1: i32) -> (i32, i32) {
    %c0_i32 = arith.constant 0 : i32
    %c0_i32_0 = arith.constant 0 : i32
    return %c0_i32, %arg1 : i32, i32
  }
  func.func @transform_3(%arg0: i32, %arg1: i32) -> (i32, i32) {
    %c0_i32 = arith.constant 0 : i32
    return %arg0, %arg1 : i32, i32
  }
}

module attributes {stable_mosaic.version = 11 : i64} {
  func.func @lstm_seq_kernel(%arg0: i32, %arg1: memref<8x8x512xf32, #tpu.memory_space<vmem>>, %arg2: memref<8x128xf32, #tpu.memory_space<vmem>>, %arg3: memref<8x128xf32, #tpu.memory_space<vmem>>, %arg4: memref<128x512xbf16, #tpu.memory_space<vmem>>, %arg5: memref<1x8x128xf32, #tpu.memory_space<vmem>>, %arg6: memref<1x8x128xf32, #tpu.memory_space<vmem>>, %arg7: memref<1x8x128xbf16, #tpu.memory_space<vmem>>, %arg8: memref<8x128xf32, #tpu.memory_space<vmem>>, %arg9: memref<8x128xbf16, #tpu.memory_space<vmem>>) attributes {dimension_semantics = [#tpu.dimension_semantics<arbitrary>], iteration_bounds = array<i64: 8>, scalar_prefetch = 0 : i64, scratch_operands = 2 : i64, tpu.core_type = #tpu.core_type<tc>, window_params = [{pipeline_mode = #tpu.pipeline_mode<synchronous>, transform_indices = @transform_0, window_bounds = array<i64: 8, 8, 512>}, {pipeline_mode = #tpu.pipeline_mode<synchronous>, transform_indices = @transform_1, window_bounds = array<i64: 8, 128>}, {pipeline_mode = #tpu.pipeline_mode<synchronous>, transform_indices = @transform_2, window_bounds = array<i64: 8, 128>}, {pipeline_mode = #tpu.pipeline_mode<synchronous>, transform_indices = @transform_3, window_bounds = array<i64: 128, 512>}, {transform_indices = @transform_4, window_bounds = array<i64: 1, 8, 128>}, {transform_indices = @transform_5, window_bounds = array<i64: 1, 8, 128>}, {transform_indices = @transform_6, window_bounds = array<i64: 1, 8, 128>}]} {
    %c0_i32 = arith.constant 0 : i32
    %0 = arith.cmpi eq, %arg0, %c0_i32 : i32
    %1 = arith.extui %0 : i1 to i32
    %c0_i32_0 = arith.constant 0 : i32
    %2 = arith.cmpi ne, %1, %c0_i32_0 : i32
    scf.if %2 {
      %c0_24 = arith.constant 0 : index
      %c0_25 = arith.constant 0 : index
      %48 = vector.load %arg3[%c0_24, %c0_25] : memref<8x128xf32, #tpu.memory_space<vmem>>, vector<8x128xf32>
      %c0_26 = arith.constant 0 : index
      %c0_27 = arith.constant 0 : index
      %49 = vector.load %arg8[%c0_26, %c0_27] : memref<8x128xf32, #tpu.memory_space<vmem>>, vector<8x128xf32>
      tpu.vector_store %arg8[%c0_26, %c0_27], %48 {strides = array<i32>} : memref<8x128xf32, #tpu.memory_space<vmem>>, vector<8x128xf32>,
      %c0_28 = arith.constant 0 : index
      %c0_29 = arith.constant 0 : index
      %50 = vector.load %arg2[%c0_28, %c0_29] : memref<8x128xf32, #tpu.memory_space<vmem>>, vector<8x128xf32>
      %51 = arith.truncf %50 : vector<8x128xf32> to vector<8x128xbf16>
      %c0_30 = arith.constant 0 : index
      %c0_31 = arith.constant 0 : index
      %52 = vector.load %arg9[%c0_30, %c0_31] : memref<8x128xbf16, #tpu.memory_space<vmem>>, vector<8x128xbf16>
      tpu.vector_store %arg9[%c0_30, %c0_31], %51 {strides = array<i32>} : memref<8x128xbf16, #tpu.memory_space<vmem>>, vector<8x128xbf16>,
    } else {
    }
    %3 = arith.index_cast %arg0 : i32 to index
    %c0 = arith.constant 0 : index
    %c0_1 = arith.constant 0 : index
    %4 = vector.load %arg1[%3, %c0, %c0_1] : memref<8x8x512xf32, #tpu.memory_space<vmem>>, vector<1x8x512xf32>
    %5 = vector.shape_cast %4 : vector<1x8x512xf32> to vector<8x512xf32>
    %c0_2 = arith.constant 0 : index
    %c0_3 = arith.constant 0 : index
    %6 = vector.load %arg9[%c0_2, %c0_3] : memref<8x128xbf16, #tpu.memory_space<vmem>>, vector<8x128xbf16>
    %c0_4 = arith.constant 0 : index
    %c0_5 = arith.constant 0 : index
    %7 = vector.load %arg4[%c0_4, %c0_5] : memref<128x512xbf16, #tpu.memory_space<vmem>>, vector<128x512xbf16>
    %cst = arith.constant dense<0.000000e+00> : vector<8x512xf32>
    %8 = tpu.matmul %6, %7, %cst {dimension_numbers = #tpu.dot_dimension_numbers<[1], [0], [0], [1], [0, 0, 1, 1], [], []>} : vector<8x128xbf16>, vector<128x512xbf16>, vector<8x512xf32> -> vector<8x512xf32>
    %9 = arith.addf %5, %8 : vector<8x512xf32>
    %10 = vector.extract_strided_slice %9 {offsets = [0, 0], sizes = [8, 128], strides = [1, 1]} : vector<8x512xf32> to vector<8x128xf32>
    %11 = arith.negf %10 : vector<8x128xf32>
    %12 = math.exp %11 : vector<8x128xf32>
    %cst_6 = arith.constant 1.000000e+00 : f32
    %13 = vector.broadcast %cst_6 : f32 to vector<8x128xf32>
    %14 = arith.addf %13, %12 : vector<8x128xf32>
    %15 = arith.divf %13, %14 : vector<8x128xf32>
    %16 = vector.extract_strided_slice %9 {offsets = [0, 128], sizes = [8, 128], strides = [1, 1]} : vector<8x512xf32> to vector<8x128xf32>
    %17 = arith.negf %16 : vector<8x128xf32>
    %18 = math.exp %17 : vector<8x128xf32>
    %cst_7 = arith.constant 1.000000e+00 : f32
    %19 = vector.broadcast %cst_7 : f32 to vector<8x128xf32>
    %20 = arith.addf %19, %18 : vector<8x128xf32>
    %21 = arith.divf %19, %20 : vector<8x128xf32>
    %22 = vector.extract_strided_slice %9 {offsets = [0, 256], sizes = [8, 128], strides = [1, 1]} : vector<8x512xf32> to vector<8x128xf32>
    %23 = math.tanh %22 : vector<8x128xf32>
    %24 = vector.extract_strided_slice %9 {offsets = [0, 384], sizes = [8, 128], strides = [1, 1]} : vector<8x512xf32> to vector<8x128xf32>
    %25 = arith.negf %24 : vector<8x128xf32>
    %26 = math.exp %25 : vector<8x128xf32>
    %cst_8 = arith.constant 1.000000e+00 : f32
    %27 = vector.broadcast %cst_8 : f32 to vector<8x128xf32>
    %28 = arith.addf %27, %26 : vector<8x128xf32>
    %29 = arith.divf %27, %28 : vector<8x128xf32>
    %c0_9 = arith.constant 0 : index
    %c0_10 = arith.constant 0 : index
    %30 = vector.load %arg8[%c0_9, %c0_10] : memref<8x128xf32, #tpu.memory_space<vmem>>, vector<8x128xf32>
    %31 = arith.mulf %21, %30 : vector<8x128xf32>
    %32 = arith.mulf %15, %23 : vector<8x128xf32>
    %33 = arith.addf %31, %32 : vector<8x128xf32>
    %34 = math.tanh %33 : vector<8x128xf32>
    %35 = arith.mulf %29, %34 : vector<8x128xf32>
    %36 = arith.truncf %35 : vector<8x128xf32> to vector<8x128xbf16>
    %c0_11 = arith.constant 0 : index
    %c0_12 = arith.constant 0 : index
    %37 = vector.load %arg8[%c0_11, %c0_12] : memref<8x128xf32, #tpu.memory_space<vmem>>, vector<8x128xf32>
    tpu.vector_store %arg8[%c0_11, %c0_12], %33 {strides = array<i32>} : memref<8x128xf32, #tpu.memory_space<vmem>>, vector<8x128xf32>,
    %c0_13 = arith.constant 0 : index
    %c0_14 = arith.constant 0 : index
    %38 = vector.load %arg9[%c0_13, %c0_14] : memref<8x128xbf16, #tpu.memory_space<vmem>>, vector<8x128xbf16>
    tpu.vector_store %arg9[%c0_13, %c0_14], %36 {strides = array<i32>} : memref<8x128xbf16, #tpu.memory_space<vmem>>, vector<8x128xbf16>,
    %c0_15 = arith.constant 0 : index
    %c0_16 = arith.constant 0 : index
    %c0_17 = arith.constant 0 : index
    %39 = vector.load %arg5[%c0_15, %c0_16, %c0_17] : memref<1x8x128xf32, #tpu.memory_space<vmem>>, vector<1x8x128xf32>
    %40 = vector.shape_cast %39 : vector<1x8x128xf32> to vector<8x128xf32>
    %41 = vector.shape_cast %35 : vector<8x128xf32> to vector<1x8x128xf32>
    tpu.vector_store %arg5[%c0_15, %c0_16, %c0_17], %41 {strides = array<i32>} : memref<1x8x128xf32, #tpu.memory_space<vmem>>, vector<1x8x128xf32>,
    %c0_18 = arith.constant 0 : index
    %c0_19 = arith.constant 0 : index
    %c0_20 = arith.constant 0 : index
    %42 = vector.load %arg6[%c0_18, %c0_19, %c0_20] : memref<1x8x128xf32, #tpu.memory_space<vmem>>, vector<1x8x128xf32>
    %43 = vector.shape_cast %42 : vector<1x8x128xf32> to vector<8x128xf32>
    %44 = vector.shape_cast %33 : vector<8x128xf32> to vector<1x8x128xf32>
    tpu.vector_store %arg6[%c0_18, %c0_19, %c0_20], %44 {strides = array<i32>} : memref<1x8x128xf32, #tpu.memory_space<vmem>>, vector<1x8x128xf32>,
    %c0_21 = arith.constant 0 : index
    %c0_22 = arith.constant 0 : index
    %c0_23 = arith.constant 0 : index
    %45 = vector.load %arg7[%c0_21, %c0_22, %c0_23] : memref<1x8x128xbf16, #tpu.memory_space<vmem>>, vector<1x8x128xbf16>
    %46 = vector.shape_cast %45 : vector<1x8x128xbf16> to vector<8x128xbf16>
    %47 = vector.shape_cast %36 : vector<8x128xbf16> to vector<1x8x128xbf16>
    tpu.vector_store %arg7[%c0_21, %c0_22, %c0_23], %47 {strides = array<i32>} : memref<1x8x128xbf16, #tpu.memory_space<vmem>>, vector<1x8x128xbf16>,
    return
  }
  func.func @transform_0(%arg0: i32) -> (i32, i32, i32) {
    %c0_i32 = arith.constant 0 : i32
    %c0_i32_0 = arith.constant 0 : i32
    %c0_i32_1 = arith.constant 0 : i32
    %c0_i32_2 = arith.constant 0 : i32
    return %c0_i32, %c0_i32_0, %c0_i32_1 : i32, i32, i32
  }
  func.func @transform_1(%arg0: i32) -> (i32, i32) {
    %c0_i32 = arith.constant 0 : i32
    %c0_i32_0 = arith.constant 0 : i32
    %c0_i32_1 = arith.constant 0 : i32
    return %c0_i32, %c0_i32_0 : i32, i32
  }
  func.func @transform_2(%arg0: i32) -> (i32, i32) {
    %c0_i32 = arith.constant 0 : i32
    %c0_i32_0 = arith.constant 0 : i32
    %c0_i32_1 = arith.constant 0 : i32
    return %c0_i32, %c0_i32_0 : i32, i32
  }
  func.func @transform_3(%arg0: i32) -> (i32, i32) {
    %c0_i32 = arith.constant 0 : i32
    %c0_i32_0 = arith.constant 0 : i32
    %c0_i32_1 = arith.constant 0 : i32
    return %c0_i32, %c0_i32_0 : i32, i32
  }
  func.func @transform_4(%arg0: i32) -> (i32, i32, i32) {
    %c0_i32 = arith.constant 0 : i32
    %c0_i32_0 = arith.constant 0 : i32
    %c0_i32_1 = arith.constant 0 : i32
    return %arg0, %c0_i32, %c0_i32_0 : i32, i32, i32
  }
  func.func @transform_5(%arg0: i32) -> (i32, i32, i32) {
    %c0_i32 = arith.constant 0 : i32
    %c0_i32_0 = arith.constant 0 : i32
    %c0_i32_1 = arith.constant 0 : i32
    return %arg0, %c0_i32, %c0_i32_0 : i32, i32, i32
  }
  func.func @transform_6(%arg0: i32) -> (i32, i32, i32) {
    %c0_i32 = arith.constant 0 : i32
    %c0_i32_0 = arith.constant 0 : i32
    %c0_i32_1 = arith.constant 0 : i32
    return %arg0, %c0_i32, %c0_i32_0 : i32, i32, i32
  }
}

module attributes {stable_mosaic.version = 11 : i64} {
  func.func @matmul_bias_kernel(%arg0: i32, %arg1: i32, %arg2: memref<64x128xbf16, #tpu.memory_space<vmem>>, %arg3: memref<128x256xbf16, #tpu.memory_space<vmem>>, %arg4: memref<1x256xf32, #tpu.memory_space<vmem>>, %arg5: memref<64x256xf32, #tpu.memory_space<vmem>>) attributes {dimension_semantics = [#tpu.dimension_semantics<parallel>, #tpu.dimension_semantics<parallel>], iteration_bounds = array<i64: 1, 1>, scalar_prefetch = 0 : i64, scratch_operands = 0 : i64, tpu.core_type = #tpu.core_type<tc>, window_params = [{transform_indices = @transform_0, window_bounds = array<i64: 64, 128>}, {transform_indices = @transform_1, window_bounds = array<i64: 128, 256>}, {transform_indices = @transform_2, window_bounds = array<i64: 1, 256>}, {transform_indices = @transform_3, window_bounds = array<i64: 64, 256>}]} {
    %c0 = arith.constant 0 : index
    %c0_0 = arith.constant 0 : index
    %0 = vector.load %arg2[%c0, %c0_0] : memref<64x128xbf16, #tpu.memory_space<vmem>>, vector<64x128xbf16>
    %c0_1 = arith.constant 0 : index
    %c0_2 = arith.constant 0 : index
    %1 = vector.load %arg3[%c0_1, %c0_2] : memref<128x256xbf16, #tpu.memory_space<vmem>>, vector<128x256xbf16>
    %cst = arith.constant dense<0.000000e+00> : vector<64x256xf32>
    %2 = tpu.matmul %0, %1, %cst {dimension_numbers = #tpu.dot_dimension_numbers<[1], [0], [0], [1], [0, 0, 1, 1], [], []>} : vector<64x128xbf16>, vector<128x256xbf16>, vector<64x256xf32> -> vector<64x256xf32>
    %c0_3 = arith.constant 0 : index
    %c0_4 = arith.constant 0 : index
    %3 = vector.load %arg4[%c0_3, %c0_4] : memref<1x256xf32, #tpu.memory_space<vmem>>, vector<1x256xf32>
    %4 = vector.broadcast %3 : vector<1x256xf32> to vector<64x256xf32>
    %5 = arith.addf %2, %4 : vector<64x256xf32>
    %c0_5 = arith.constant 0 : index
    %c0_6 = arith.constant 0 : index
    %6 = vector.load %arg5[%c0_5, %c0_6] : memref<64x256xf32, #tpu.memory_space<vmem>>, vector<64x256xf32>
    tpu.vector_store %arg5[%c0_5, %c0_6], %5 {strides = array<i32>} : memref<64x256xf32, #tpu.memory_space<vmem>>, vector<64x256xf32>,
    return
  }
  func.func @transform_0(%arg0: i32, %arg1: i32) -> (i32, i32) {
    %c0_i32 = arith.constant 0 : i32
    %c0_i32_0 = arith.constant 0 : i32
    return %arg0, %c0_i32 : i32, i32
  }
  func.func @transform_1(%arg0: i32, %arg1: i32) -> (i32, i32) {
    %c0_i32 = arith.constant 0 : i32
    %c0_i32_0 = arith.constant 0 : i32
    return %c0_i32, %arg1 : i32, i32
  }
  func.func @transform_2(%arg0: i32, %arg1: i32) -> (i32, i32) {
    %c0_i32 = arith.constant 0 : i32
    %c0_i32_0 = arith.constant 0 : i32
    return %c0_i32, %arg1 : i32, i32
  }
  func.func @transform_3(%arg0: i32, %arg1: i32) -> (i32, i32) {
    %c0_i32 = arith.constant 0 : i32
    return %arg0, %arg1 : i32, i32
  }
}

</mosaic_0001>

<bundles_post_ra>
// kernel: decoder_forward_sequence.5
= control target key start
LH: loop header
LB: loop body
LE: loop exit
PB: predicated region body
PF: predicated region fallthrough
CT: control target
= control target key end

     0   :  { %8 = vsyncpa [#allocation3], 0  ;;  %s550_s0 = inlined_call_operand.hbm [shape: bf16[64,128], index: 0, kind: input, shape index: {}]   ;;  %s551_s1 = inlined_call_operand.hbm [shape: bf16[128,256], index: 1, kind: input, shape index: {}]   ;;  %s552_s2 = inlined_call_operand.hbm [shape: f32[1,256], index: 2, kind: input, shape index: {}]   ;;  %s553_s3 = inlined_call_operand.hbm [shape: f32[64,256], index: 3, kind: output, shape index: {}]  }
   0x1   :  { %9 = vsyncpa [#allocation6], 0 }
   0x2   :  { %10 = vsyncpa [#allocation4], 0  ;;  %s471_s12 = smov [#allocation5]   ;;  %s377_s16 = scalar_lea.hbm %s551_s1, 2048 }
   0x3   :  { %s28_s13 = sshll.u32 %s471_s12, 4  ;;  %p378_p0 = scmp.ne.s32.totalorder %s551_s1, %s377_s16  ;;  %s29_s13 = int_to_ptr.vmem [resolvable:$true] %s28_s13 }
   0x4   :  { %p381_p1 = scmp.lt.u32.totalorder %s377_s16, %s551_s1 }
   0x6   :  { %p383_p2 = pnand %p381_p1, %p378_p0 }
   0x8   :  { %386 = shalt.err (!%p383_p2)
}
   0x9   :  { %s387_s21 = scalar_lea.vmem %s29_s13, 2048  ;;  %p392_p4 = scmp.lt.s32.totalorder %s29_s13, %s29_s13 }
   0xa   :  { %p388_p3 = scmp.ne.s32.totalorder %s29_s13, %s387_s21  ;;  %p393_p5 = scmp.lt.s32.totalorder %s387_s21, %s387_s21 }
   0xc   :  { %p394_p6 = por %p393_p5, %p392_p4 }
   0xe   :  { %p395_p7 = pnand %p394_p6, %p388_p3 }
  0x10   :  { %398 = shalt.err (!%p395_p7)
}
  0x11   :  { %s472_s22 = smov 128   ;;  %s473_s23 = smov 8  }
  0x12   :  { %34 = dma.hbm_to_vmem [thread:$0]  %s551_s1, 2048, %s29_s13, [#allocation6], %s472_s22, %s472_s22, %s473_s23  }
  0x13   :  { %s474_s26 = smov [#allocation2]   ;;  %s399_s30 = scalar_lea.hbm %s550_s0, 512 }
  0x14   :  { %s16_s27 = sshll.u32 %s474_s26, 4  ;;  %p400_p8 = scmp.ne.s32.totalorder %s550_s0, %s399_s30  ;;  %s17_s27 = int_to_ptr.vmem [resolvable:$true] %s16_s27 }
  0x15   :  { %p403_p9 = scmp.lt.u32.totalorder %s399_s30, %s550_s0 }
  0x17   :  { %p405_p10 = pnand %p403_p9, %p400_p8 }
  0x19   :  { %408 = shalt.err (!%p405_p10)
}
  0x1a   :  { %s409_s8 = scalar_lea.vmem %s17_s27, 512  ;;  %p414_p12 = scmp.lt.s32.totalorder %s17_s27, %s17_s27 }
  0x1b   :  { %p410_p11 = scmp.ne.s32.totalorder %s17_s27, %s409_s8  ;;  %p415_p13 = scmp.lt.s32.totalorder %s409_s8, %s409_s8 }
  0x1d   :  { %p416_p0 = por %p415_p13, %p414_p12 }
  0x1f   :  { %p417_p1 = pnand %p416_p0, %p410_p11 }
  0x21   :  { %420 = shalt.err (!%p417_p1)
}
  0x22   :  { %s475_s1 = smov 64   ;;  %s476_s9 = smov 4  }
  0x23   :  { %22 = dma.hbm_to_vmem [thread:$0]  %s550_s0, 512, %s17_s27, [#allocation3], %s475_s1, %s475_s1, %s476_s9  }
  0x24   :  { %s477_s12 = smov [#allocation7]   ;;  %s421_s16 = scalar_lea.hbm %s552_s2, 32 }
  0x25   :  { %s41_s13 = sshll.u32 %s477_s12, 4  ;;  %p422_p2 = scmp.ne.s32.totalorder %s552_s2, %s421_s16  ;;  %s42_s13 = int_to_ptr.vmem [resolvable:$true] %s41_s13 }
  0x26   :  { %p425_p3 = scmp.lt.u32.totalorder %s421_s16, %s552_s2 }
  0x28   :  { %p427_p4 = pnand %p425_p3, %p422_p2 }
  0x2a   :  { %430 = shalt.err (!%p427_p4)
}
  0x2b   :  { %s431_s21 = scalar_lea.vmem %s42_s13, 32  ;;  %p436_p6 = scmp.lt.s32.totalorder %s42_s13, %s42_s13 }
  0x2c   :  { %p432_p5 = scmp.ne.s32.totalorder %s42_s13, %s431_s21  ;;  %p437_p7 = scmp.lt.s32.totalorder %s431_s21, %s431_s21 }
  0x2e   :  { %p438_p8 = por %p437_p7, %p436_p6 }
  0x30   :  { %p439_p9 = pnand %p438_p8, %p432_p5 }
  0x32   :  { %442 = shalt.err (!%p439_p9)
}
  0x33   :  { %44 = dma.hbm_to_vmem [thread:$0]  %s552_s2, 32, %s42_s13, [#allocation6]  }
  0x34   :  { %465 = dma.done.wait [#allocation3], 512  }
  0x35   :  { %466 = vsyncadd [#allocation3], 4294966784 }
  0x36   :  { %467 = dma.done.wait [#allocation6], 2080  }
  0x37   :  { %468 = vsyncadd [#allocation6], 4294965216  ;;  %v478_v0 = vmov 0   ;;  %v349_v1 = vld [vmem:[#allocation5 + $0x4] ss:$8 sps:$4 sm:$0xff]   ;;  %v374_v18 = vld [vmem:[#allocation2 + $0x10] sm:$0xff]   ;;  %v81_v21 = vlaneseq }
  0x38   :  { %227 = vmatprep.mubr.bf16.mxu0 %v478_v0  ;;  %247 = vmatprep.mubr.bf16.mxu1 %v478_v0  ;;  %v351_v2 = vld [vmem:[#allocation5] ss:$8 sps:$4 sm:$0xff]   ;;  %v352_v3 = vld [vmem:[#allocation5 + $0x14] ss:$8 sps:$4 sm:$0xff]   ;;  %v354_v4 = vld [vmem:[#allocation5 + $0x10] ss:$8 sps:$4 sm:$0xff]  }
  0x39   :  { %195 = vmatprep.subr.bf16.mxu0 %v349_v1  ;;  %322 = vmatprep.subr.bf16.mxu1 %v349_v1  ;;  %v355_v5 = vld [vmem:[#allocation5 + $0x24] ss:$8 sps:$4 sm:$0xff]   ;;  %v357_v6 = vld [vmem:[#allocation5 + $0x20] ss:$8 sps:$4 sm:$0xff]   ;;  %v358_v7 = vld [vmem:[#allocation5 + $0x34] ss:$8 sps:$4 sm:$0xff]  }
  0x3a   :  { %196 = vmatpush1.bf16.msra.mxu0 %v351_v2  ;;  %330 = vmatpush1.bf16.msra.mxu1 %v351_v2  ;;  %v360_v8 = vld [vmem:[#allocation5 + $0x30] ss:$8 sps:$4 sm:$0xff]   ;;  %v361_v9 = vld [vmem:[#allocation5 + $0x44] ss:$8 sps:$4 sm:$0xff]   ;;  %v363_v10 = vld [vmem:[#allocation5 + $0x40] ss:$8 sps:$4 sm:$0xff]  }
  0x3b   :  { %197 = vmatprep.subr.bf16.mxu0 %v352_v3  ;;  %323 = vmatprep.subr.bf16.mxu1 %v352_v3  ;;  %v364_v11 = vld [vmem:[#allocation5 + $0x54] ss:$8 sps:$4 sm:$0xff]   ;;  %v366_v12 = vld [vmem:[#allocation5 + $0x50] ss:$8 sps:$4 sm:$0xff]   ;;  %v367_v13 = vld [vmem:[#allocation5 + $0x64] ss:$8 sps:$4 sm:$0xff]  }
  0x3c   :  { %v369_v14 = vld [vmem:[#allocation5 + $0x60] ss:$8 sps:$4 sm:$0xff]   ;;  %v370_v15 = vld [vmem:[#allocation5 + $0x74] ss:$8 sps:$4 sm:$0xff]   ;;  %v372_v16 = vld [vmem:[#allocation5 + $0x70] ss:$8 sps:$4 sm:$0xff]  }
  0x3d   :  { %v373_v17 = vld [vmem:[#allocation2] sm:$0xff]   ;;  %v375_v19 = vld [vmem:[#allocation2 + $0x8] sm:$0xff]   ;;  %v376_v20 = vld [vmem:[#allocation2 + $0x18] sm:$0xff]   ;;  %v82_v22 = vshrl.u32 %v81_v21, 7  ;;  %s479_s2 = smov [#allocation8]  }
  0x3e   :  { %198 = vmatpush1.bf16.msra.mxu0 %v354_v4  ;;  %331 = vmatpush1.bf16.msra.mxu1 %v354_v4  ;;  %v79_v24 = vld [vmem:[#allocation7] sm:$0x3]  ;;  %s289_s23 = sshll.u32 %s479_s2, 4  ;;  %s290_s23 = int_to_ptr.vmem [resolvable:$true] %s289_s23 }
  0x3f   :  { %199 = vmatprep.subr.bf16.mxu0 %v355_v5  ;;  %324 = vmatprep.subr.bf16.mxu1 %v355_v5  ;;  %v83_v23 = vsub.s32 0, %v82_v22  ;;  %v87_v25 = vsub.s32 1, %v82_v22  ;;  %s443_s24 = scalar_lea.vmem %s290_s23, 2048  ;;  %p448_p11 = scmp.lt.s32.totalorder %s290_s23, %s290_s23 }
  0x40   :  { %p444_p10 = scmp.ne.s32.totalorder %s290_s23, %s443_s24  ;;  %p449_p12 = scmp.lt.s32.totalorder %s443_s24, %s443_s24 }
  0x41   :  { %v84_v26 = vrot.slane %v79_v24, %v83_v23  ;;  %v88_v27 = vrot.slane %v79_v24, %v87_v25 }
  0x42   :  { %200 = vmatpush1.bf16.msra.mxu0 %v357_v6  ;;  %332 = vmatpush1.bf16.msra.mxu1 %v357_v6  ;;  %p450_p13 = por %p449_p12, %p448_p11 }
  0x43   :  { %201 = vmatprep.subr.bf16.mxu0 %v358_v7  ;;  %325 = vmatprep.subr.bf16.mxu1 %v358_v7 }
  0x44   :  { %p451_p0 = pnand %p450_p13, %p444_p10 }
  0x46   :  { %202 = vmatpush1.bf16.msra.mxu0 %v360_v8  ;;  %333 = vmatpush1.bf16.msra.mxu1 %v360_v8 }
  0x47   :  { %203 = vmatprep.subr.bf16.mxu0 %v361_v9  ;;  %326 = vmatprep.subr.bf16.mxu1 %v361_v9 }
  0x4a   :  { %204 = vmatpush1.bf16.msra.mxu0 %v363_v10  ;;  %334 = vmatpush1.bf16.msra.mxu1 %v363_v10 }
  0x4b   :  { %205 = vmatprep.subr.bf16.mxu0 %v364_v11  ;;  %327 = vmatprep.subr.bf16.mxu1 %v364_v11 }
  0x4e   :  { %206 = vmatpush1.bf16.msra.mxu0 %v366_v12  ;;  %335 = vmatpush1.bf16.msra.mxu1 %v366_v12 }
  0x4f   :  { %207 = vmatprep.subr.bf16.mxu0 %v367_v13  ;;  %328 = vmatprep.subr.bf16.mxu1 %v367_v13 }
  0x52   :  { %208 = vmatpush1.bf16.msra.mxu0 %v369_v14  ;;  %336 = vmatpush1.bf16.msra.mxu1 %v369_v14 }
  0x53   :  { %209 = vmatprep.subr.bf16.mxu0 %v370_v15  ;;  %329 = vmatprep.subr.bf16.mxu1 %v370_v15 }
  0x56   :  { %210 = vmatpush1.bf16.msra.mxu0 %v372_v16  ;;  %337 = vmatpush1.bf16.msra.mxu1 %v372_v16 }
  0x59   :  { %228 = vmatmul.mubr.bf16.vlgmr.msra.gmra.mrb[0].mxu0 %v373_v17  ;;  %248 = vmatmul.mubr.bf16.vlgmr.msra.gmra.mrb[0].mxu1 %v374_v18 }
  0x5a   :  { %237 = vmatprep.mubr.bf16.mxu0 %v478_v0  ;;  %257 = vmatprep.mubr.bf16.mxu1 %v478_v0 }
  0x61   :  { %238 = vmatmul.mubr.bf16.gmra.mrb[4].mxu0 %v375_v19  ;;  %258 = vmatmul.mubr.bf16.gmra.mrb[4].mxu1 %v376_v20 }
 0x12c   :  { %v229_v28 = vpop.f32.mrb[0].mxu0  ;;  %v249_v29 = vpop.f32.mrb[0].mxu1 }
 0x12d   :  { %v230_v30 = vadd.f32 %v229_v28, %v84_v26  ;;  %v250_v31 = vadd.f32 %v249_v29, %v84_v26  ;;  %v231_v32 = vpop.f32.mrb[1].mxu0  ;;  %v251_v33 = vpop.f32.mrb[1].mxu1 }
 0x12e   :  { %v232_v34 = vadd.f32 %v231_v32, %v88_v27  ;;  %v252_v35 = vadd.f32 %v251_v33, %v88_v27  ;;  %v233_v36 = vpop.f32.mrb[2].mxu0  ;;  %v253_v37 = vpop.f32.mrb[2].mxu1 }
 0x12f   :  { %268 = vst [vmem:[#allocation8] sm:$0xff] %v230_v30  ;;  %276 = vst [vmem:[#allocation8 + $0x40] sm:$0xff] %v250_v31  ;;  %v234_v38 = vadd.f32 %v233_v36, %v84_v26  ;;  %v254_v39 = vadd.f32 %v253_v37, %v84_v26  ;;  %v235_v40 = vpop.f32.mrb[3].mxu0  ;;  %v255_v41 = vpop.f32.mrb[3].mxu1 }
 0x130   :  { %269 = vst [vmem:[#allocation8 + $0x8] sm:$0xff] %v232_v34  ;;  %277 = vst [vmem:[#allocation8 + $0x48] sm:$0xff] %v252_v35  ;;  %v236_v42 = vadd.f32 %v235_v40, %v88_v27  ;;  %v256_v43 = vadd.f32 %v255_v41, %v88_v27 }
 0x131   :  { %270 = vst [vmem:[#allocation8 + $0x10] sm:$0xff] %v234_v38  ;;  %278 = vst [vmem:[#allocation8 + $0x50] sm:$0xff] %v254_v39 }
 0x132   :  { %271 = vst [vmem:[#allocation8 + $0x18] sm:$0xff] %v236_v42  ;;  %279 = vst [vmem:[#allocation8 + $0x58] sm:$0xff] %v256_v43 }
 0x134   :  { %v239_v44 = vpop.f32.mrb[4].mxu0  ;;  %v259_v45 = vpop.f32.mrb[4].mxu1 }
 0x135   :  { %v240_v46 = vadd.f32 %v239_v44, %v84_v26  ;;  %v260_v47 = vadd.f32 %v259_v45, %v84_v26  ;;  %v241_v48 = vpop.f32.mrb[5].mxu0  ;;  %v261_v49 = vpop.f32.mrb[5].mxu1 }
 0x136   :  { %v242_v50 = vadd.f32 %v241_v48, %v88_v27  ;;  %v262_v51 = vadd.f32 %v261_v49, %v88_v27  ;;  %v243_v52 = vpop.f32.mrb[6].mxu0  ;;  %v263_v53 = vpop.f32.mrb[6].mxu1 }
 0x137   :  { %272 = vst [vmem:[#allocation8 + $0x20] sm:$0xff] %v240_v46  ;;  %280 = vst [vmem:[#allocation8 + $0x60] sm:$0xff] %v260_v47  ;;  %v244_v54 = vadd.f32 %v243_v52, %v84_v26  ;;  %v264_v55 = vadd.f32 %v263_v53, %v84_v26  ;;  %v245_v56 = vpop.f32.mrb[7].mxu0  ;;  %v265_v57 = vpop.f32.mrb[7].mxu1 }
 0x138   :  { %273 = vst [vmem:[#allocation8 + $0x28] sm:$0xff] %v242_v50  ;;  %281 = vst [vmem:[#allocation8 + $0x68] sm:$0xff] %v262_v51  ;;  %v246_v58 = vadd.f32 %v245_v56, %v88_v27  ;;  %v266_v59 = vadd.f32 %v265_v57, %v88_v27 }
 0x139   :  { %274 = vst [vmem:[#allocation8 + $0x30] sm:$0xff] %v244_v54  ;;  %282 = vst [vmem:[#allocation8 + $0x70] sm:$0xff] %v264_v55 }
 0x13a   :  { %275 = vst [vmem:[#allocation8 + $0x38] sm:$0xff] %v246_v58  ;;  %283 = vst [vmem:[#allocation8 + $0x78] sm:$0xff] %v266_v59 }
 0x13b   :  { %454 = shalt.err (!%p451_p0)
}
 0x13c   :  { %s455_s27 = scalar_lea.hbm %s553_s3, 2048 }
 0x13d   :  { %p456_p1 = scmp.ne.s32.totalorder %s553_s3, %s455_s27  ;;  %p459_p2 = scmp.lt.u32.totalorder %s455_s27, %s553_s3 }
 0x13f   :  { %p461_p3 = pnand %p459_p2, %p456_p1 }
 0x141   :  { %464 = shalt.err (!%p461_p3)
}
 0x142   :  { %s480_s5 = smov 256   ;;  %s481_s6 = smov 16  }
 0x143   :  { %295 = dma.vmem_to_hbm [thread:$0]  %s290_s23, 2048, %s553_s3, [#allocation4], %s480_s5, %s480_s5, %s481_s6  }
 0x144   :  { %469 = dma.done.wait [#allocation4], 2048  }
 0x145   :  { %470 = vsyncadd [#allocation4], 4294965248 }
 0x146   :  { %299 = vsyncpa [#allocation3], 1 }
 0x147   :  { %300 = vsyncpa [#allocation6], 1 }
 0x148   :  { %301 = vsyncpa [#allocation4], 1 }

// kernel: decoder_forward_sequence.3
= control target key start
LH: loop header
LB: loop body
LE: loop exit
PB: predicated region body
PF: predicated region fallthrough
CT: control target
= control target key end

     0   :  { %8 = vsyncpa [#allocation3], 0  ;;  %s630_s0 = inlined_call_operand.hbm [shape: bf16[64,32], index: 0, kind: input, shape index: {}]   ;;  %s631_s1 = inlined_call_operand.hbm [shape: bf16[32,512], index: 1, kind: input, shape index: {}]   ;;  %s632_s2 = inlined_call_operand.hbm [shape: f32[1,512], index: 2, kind: input, shape index: {}]   ;;  %s633_s3 = inlined_call_operand.hbm [shape: f32[64,512], index: 3, kind: output, shape index: {}]  }
   0x1   :  { %9 = vsyncpa [#allocation6], 0 }
   0x2   :  { %10 = vsyncpa [#allocation4], 0  ;;  %s503_s12 = smov [#allocation5]   ;;  %s409_s16 = scalar_lea.hbm %s631_s1, 1024 }
   0x3   :  { %s28_s13 = sshll.u32 %s503_s12, 4  ;;  %p410_p0 = scmp.ne.s32.totalorder %s631_s1, %s409_s16  ;;  %s29_s13 = int_to_ptr.vmem [resolvable:$true] %s28_s13 }
   0x4   :  { %p413_p1 = scmp.lt.u32.totalorder %s409_s16, %s631_s1 }
   0x6   :  { %p415_p2 = pnand %p413_p1, %p410_p0 }
   0x8   :  { %418 = shalt.err (!%p415_p2)
}
   0x9   :  { %s419_s21 = scalar_lea.vmem %s29_s13, 1024  ;;  %p424_p4 = scmp.lt.s32.totalorder %s29_s13, %s29_s13 }
   0xa   :  { %p420_p3 = scmp.ne.s32.totalorder %s29_s13, %s419_s21  ;;  %p425_p5 = scmp.lt.s32.totalorder %s419_s21, %s419_s21 }
   0xc   :  { %p426_p6 = por %p425_p5, %p424_p4 }
   0xe   :  { %p427_p7 = pnand %p426_p6, %p420_p3 }
  0x10   :  { %430 = shalt.err (!%p427_p7)
}
  0x11   :  { %s504_s22 = smov 256   ;;  %s505_s23 = smov 16  }
  0x12   :  { %34 = dma.hbm_to_vmem [thread:$0]  %s631_s1, 1024, %s29_s13, [#allocation6], %s504_s22, %s504_s22, %s505_s23  }
  0x13   :  { %s506_s26 = smov [#allocation2]   ;;  %s431_s30 = scalar_lea.hbm %s630_s0, 512 }
  0x14   :  { %s16_s27 = sshll.u32 %s506_s26, 4  ;;  %p432_p8 = scmp.ne.s32.totalorder %s630_s0, %s431_s30  ;;  %s17_s27 = int_to_ptr.vmem [resolvable:$true] %s16_s27 }
  0x15   :  { %p435_p9 = scmp.lt.u32.totalorder %s431_s30, %s630_s0 }
  0x17   :  { %p437_p10 = pnand %p435_p9, %p432_p8 }
  0x19   :  { %440 = shalt.err (!%p437_p10)
}
  0x1a   :  { %s441_s8 = scalar_lea.vmem %s17_s27, 512  ;;  %p446_p12 = scmp.lt.s32.totalorder %s17_s27, %s17_s27 }
  0x1b   :  { %p442_p11 = scmp.ne.s32.totalorder %s17_s27, %s441_s8  ;;  %p447_p13 = scmp.lt.s32.totalorder %s441_s8, %s441_s8 }
  0x1d   :  { %p448_p0 = por %p447_p13, %p446_p12 }
  0x1f   :  { %p449_p1 = pnand %p448_p0, %p442_p11 }
  0x21   :  { %452 = shalt.err (!%p449_p1)
}
  0x22   :  { %s507_s1 = smov 64   ;;  %s508_s9 = smov 4  }
  0x23   :  { %22 = dma.hbm_to_vmem [thread:$0]  %s630_s0, 512, %s17_s27, [#allocation3], %s507_s1, %s507_s1, %s508_s9  }
  0x24   :  { %s509_s12 = smov [#allocation7]   ;;  %s453_s16 = scalar_lea.hbm %s632_s2, 64 }
  0x25   :  { %s41_s13 = sshll.u32 %s509_s12, 4  ;;  %p454_p2 = scmp.ne.s32.totalorder %s632_s2, %s453_s16  ;;  %s42_s13 = int_to_ptr.vmem [resolvable:$true] %s41_s13 }
  0x26   :  { %p457_p3 = scmp.lt.u32.totalorder %s453_s16, %s632_s2 }
  0x28   :  { %p459_p4 = pnand %p457_p3, %p454_p2 }
  0x2a   :  { %462 = shalt.err (!%p459_p4)
}
  0x2b   :  { %s463_s21 = scalar_lea.vmem %s42_s13, 64  ;;  %p468_p6 = scmp.lt.s32.totalorder %s42_s13, %s42_s13 }
  0x2c   :  { %p464_p5 = scmp.ne.s32.totalorder %s42_s13, %s463_s21  ;;  %p469_p7 = scmp.lt.s32.totalorder %s463_s21, %s463_s21 }
  0x2e   :  { %p470_p8 = por %p469_p7, %p468_p6 }
  0x30   :  { %p471_p9 = pnand %p470_p8, %p464_p5 }
  0x32   :  { %474 = shalt.err (!%p471_p9)
}
  0x33   :  { %44 = dma.hbm_to_vmem [thread:$0]  %s632_s2, 64, %s42_s13, [#allocation6]  }
  0x34   :  { %497 = dma.done.wait [#allocation3], 512  }
  0x35   :  { %498 = vsyncadd [#allocation3], 4294966784 }
  0x36   :  { %499 = dma.done.wait [#allocation6], 1088  }
  0x37   :  { %500 = vsyncadd [#allocation6], 4294966208  ;;  %v510_v0 = vmov 0   ;;  %v393_v1 = vld [vmem:[#allocation5 + $0x4] ss:$16 sps:$4 sm:$0xff]   ;;  %vm153_vm0 = vcmask 261120   ;;  %v73_v13 = vlaneseq }
  0x38   :  { %198 = vmatprep.mubr.bf16.mxu0 %v510_v0  ;;  %271 = vmatprep.mubr.bf16.mxu1 %v510_v0  ;;  %v395_v2 = vld [vmem:[#allocation5 + $0xc] ss:$16 sps:$4 sm:$0xff]   ;;  %v397_v3 = vld [vmem:[#allocation5] ss:$16 sps:$4 sm:$0xff]   ;;  %v398_v4 = vld [vmem:[#allocation5 + $0x8] ss:$16 sps:$4 sm:$0xff]  }
  0x39   :  { %166 = vmatprep.subr.bf16.mxu0 %v393_v1  ;;  %239 = vmatprep.subr.bf16.mxu1 %v395_v2  ;;  %v399_v5 = vld [vmem:[#allocation5 + $0x24] ss:$16 sps:$4 sm:$0xff]   ;;  %v401_v6 = vld [vmem:[#allocation5 + $0x2c] ss:$16 sps:$4 sm:$0xff]   ;;  %v403_v7 = vld [vmem:[#allocation5 + $0x20] ss:$16 sps:$4 sm:$0xff]  }
  0x3a   :  { %167 = vmatpush1.bf16.msra.mxu0 %v397_v3  ;;  %240 = vmatpush1.bf16.msra.mxu1 %v398_v4  ;;  %v404_v8 = vld [vmem:[#allocation5 + $0x28] ss:$16 sps:$4 sm:$0xff]   ;;  %v405_v9 = vld [vmem:[#allocation2] sm:$0xff]   ;;  %v407_v11 = vld [vmem:[#allocation2 + $0x10] sm:$0xff]   ;;  %v74_v14 = vshrl.u32 %v73_v13, 7  ;;  %s511_s2 = smov [#allocation8]  }
  0x3b   :  { %168 = vmatprep.subr.bf16.mxu0 %v399_v5  ;;  %241 = vmatprep.subr.bf16.mxu1 %v401_v6  ;;  %v406_v10 = vld [vmem:[#allocation2 + $0x8] sm:$0xff]   ;;  %v408_v12 = vld [vmem:[#allocation2 + $0x18] sm:$0xff]   ;;  %v71_v17 = vld [vmem:[#allocation7] sm:$0xf]  ;;  %s349_s23 = sshll.u32 %s511_s2, 4  ;;  %s350_s23 = int_to_ptr.vmem [resolvable:$true] %s349_s23 }
  0x3c   :  { %v75_v15 = vsub.s32 0, %v74_v14  ;;  %v83_v16 = vsub.s32 2, %v74_v14  ;;  %v79_v18 = vsub.s32 1, %v74_v14  ;;  %v87_v19 = vsub.s32 3, %v74_v14  ;;  %s475_s24 = scalar_lea.vmem %s350_s23, 4096  ;;  %p480_p11 = scmp.lt.s32.totalorder %s350_s23, %s350_s23 }
  0x3d   :  { %p476_p10 = scmp.ne.s32.totalorder %s350_s23, %s475_s24  ;;  %p481_p12 = scmp.lt.s32.totalorder %s475_s24, %s475_s24 }
  0x3e   :  { %169 = vmatpush1.bf16.msra.mxu0 %v403_v7  ;;  %242 = vmatpush1.bf16.msra.mxu1 %v404_v8  ;;  %v578_v20 = vrot.slane %v71_v17, %v75_v15  ;;  %v580_v21 = vrot.slane %v71_v17, %v83_v16  ;;  %v582_v22 = vrot.slane %v71_v17, %v79_v18 }
  0x3f   :  { %v584_v23 = vrot.slane %v71_v17, %v87_v19  ;;  %p482_p13 = por %p481_p12, %p480_p11 }
  0x41   :  { %374 = vmatmul.mubr.msk.bf16.vlgmr.msra.gmra.mrb[0].mxu0 %vm153_vm0, %v405_v9  ;;  %378 = vmatmul.mubr.msk.bf16.vlgmr.msra.gmra.mrb[0].mxu1 %vm153_vm0, %v405_v9  ;;  %p483_p0 = pnand %p482_p13, %p476_p10 }
  0x42   :  { %208 = vmatprep.mubr.bf16.mxu0 %v510_v0  ;;  %281 = vmatprep.mubr.bf16.mxu1 %v510_v0 }
  0x49   :  { %375 = vmatmul.mubr.msk.bf16.gmra.mrb[4].mxu0 %vm153_vm0, %v406_v10  ;;  %379 = vmatmul.mubr.msk.bf16.gmra.mrb[4].mxu1 %vm153_vm0, %v406_v10 }
  0x4a   :  { %218 = vmatprep.mubr.bf16.mxu0 %v510_v0  ;;  %291 = vmatprep.mubr.bf16.mxu1 %v510_v0 }
  0x51   :  { %376 = vmatmul.mubr.msk.bf16.gmra.mrb[8].mxu0 %vm153_vm0, %v407_v11  ;;  %380 = vmatmul.mubr.msk.bf16.gmra.mrb[8].mxu1 %vm153_vm0, %v407_v11 }
  0x52   :  { %228 = vmatprep.mubr.bf16.mxu0 %v510_v0  ;;  %301 = vmatprep.mubr.bf16.mxu1 %v510_v0 }
  0x59   :  { %377 = vmatmul.mubr.msk.bf16.gmra.mrb[12].mxu0 %vm153_vm0, %v408_v12  ;;  %381 = vmatmul.mubr.msk.bf16.gmra.mrb[12].mxu1 %vm153_vm0, %v408_v12 }
 0x114   :  { %v200_v24 = vpop.f32.mrb[0].mxu0  ;;  %v273_v25 = vpop.f32.mrb[0].mxu1 }
 0x115   :  { %v201_v26 = vadd.f32 %v200_v24, %v578_v20  ;;  %v274_v27 = vadd.f32 %v273_v25, %v580_v21  ;;  %v202_v28 = vpop.f32.mrb[1].mxu0  ;;  %v275_v29 = vpop.f32.mrb[1].mxu1 }
 0x116   :  { %v203_v30 = vadd.f32 %v202_v28, %v582_v22  ;;  %v276_v31 = vadd.f32 %v275_v29, %v584_v23  ;;  %v204_v32 = vpop.f32.mrb[2].mxu0  ;;  %v277_v33 = vpop.f32.mrb[2].mxu1 }
 0x117   :  { %312 = vst [vmem:[#allocation8] sm:$0xff] %v201_v26  ;;  %314 = vst [vmem:[#allocation8 + $0x10] sm:$0xff] %v274_v27  ;;  %v205_v34 = vadd.f32 %v204_v32, %v578_v20  ;;  %v278_v35 = vadd.f32 %v277_v33, %v580_v21  ;;  %v206_v36 = vpop.f32.mrb[3].mxu0  ;;  %v279_v37 = vpop.f32.mrb[3].mxu1 }
 0x118   :  { %313 = vst [vmem:[#allocation8 + $0x8] sm:$0xff] %v203_v30  ;;  %315 = vst [vmem:[#allocation8 + $0x18] sm:$0xff] %v276_v31  ;;  %v207_v38 = vadd.f32 %v206_v36, %v582_v22  ;;  %v280_v39 = vadd.f32 %v279_v37, %v584_v23 }
 0x119   :  { %316 = vst [vmem:[#allocation8 + $0x20] sm:$0xff] %v205_v34  ;;  %318 = vst [vmem:[#allocation8 + $0x30] sm:$0xff] %v278_v35 }
 0x11a   :  { %317 = vst [vmem:[#allocation8 + $0x28] sm:$0xff] %v207_v38  ;;  %319 = vst [vmem:[#allocation8 + $0x38] sm:$0xff] %v280_v39 }
 0x11c   :  { %v210_v40 = vpop.f32.mrb[4].mxu0  ;;  %v283_v41 = vpop.f32.mrb[4].mxu1 }
 0x11d   :  { %v211_v42 = vadd.f32 %v210_v40, %v578_v20  ;;  %v284_v43 = vadd.f32 %v283_v41, %v580_v21  ;;  %v212_v44 = vpop.f32.mrb[5].mxu0  ;;  %v285_v45 = vpop.f32.mrb[5].mxu1 }
 0x11e   :  { %v213_v46 = vadd.f32 %v212_v44, %v582_v22  ;;  %v286_v47 = vadd.f32 %v285_v45, %v584_v23  ;;  %v214_v48 = vpop.f32.mrb[6].mxu0  ;;  %v287_v49 = vpop.f32.mrb[6].mxu1 }
 0x11f   :  { %320 = vst [vmem:[#allocation8 + $0x40] sm:$0xff] %v211_v42  ;;  %322 = vst [vmem:[#allocation8 + $0x50] sm:$0xff] %v284_v43  ;;  %v215_v50 = vadd.f32 %v214_v48, %v578_v20  ;;  %v288_v51 = vadd.f32 %v287_v49, %v580_v21  ;;  %v216_v52 = vpop.f32.mrb[7].mxu0  ;;  %v289_v53 = vpop.f32.mrb[7].mxu1 }
 0x120   :  { %321 = vst [vmem:[#allocation8 + $0x48] sm:$0xff] %v213_v46  ;;  %323 = vst [vmem:[#allocation8 + $0x58] sm:$0xff] %v286_v47  ;;  %v217_v54 = vadd.f32 %v216_v52, %v582_v22  ;;  %v290_v55 = vadd.f32 %v289_v53, %v584_v23 }
 0x121   :  { %324 = vst [vmem:[#allocation8 + $0x60] sm:$0xff] %v215_v50  ;;  %326 = vst [vmem:[#allocation8 + $0x70] sm:$0xff] %v288_v51 }
 0x122   :  { %325 = vst [vmem:[#allocation8 + $0x68] sm:$0xff] %v217_v54  ;;  %327 = vst [vmem:[#allocation8 + $0x78] sm:$0xff] %v290_v55 }
 0x124   :  { %v220_v56 = vpop.f32.mrb[8].mxu0  ;;  %v293_v57 = vpop.f32.mrb[8].mxu1 }
 0x125   :  { %v221_v58 = vadd.f32 %v220_v56, %v578_v20  ;;  %v294_v59 = vadd.f32 %v293_v57, %v580_v21  ;;  %v222_v60 = vpop.f32.mrb[9].mxu0  ;;  %v295_v61 = vpop.f32.mrb[9].mxu1 }
 0x126   :  { %v223_v62 = vadd.f32 %v222_v60, %v582_v22  ;;  %v296_v63 = vadd.f32 %v295_v61, %v584_v23  ;;  %v224_v0 = vpop.f32.mrb[10].mxu0  ;;  %v297_v1 = vpop.f32.mrb[10].mxu1 }
 0x127   :  { %328 = vst [vmem:[#allocation8 + $0x80] sm:$0xff] %v221_v58  ;;  %330 = vst [vmem:[#allocation8 + $0x90] sm:$0xff] %v294_v59  ;;  %v225_v2 = vadd.f32 %v224_v0, %v578_v20  ;;  %v298_v3 = vadd.f32 %v297_v1, %v580_v21  ;;  %v226_v4 = vpop.f32.mrb[11].mxu0  ;;  %v299_v5 = vpop.f32.mrb[11].mxu1 }
 0x128   :  { %329 = vst [vmem:[#allocation8 + $0x88] sm:$0xff] %v223_v62  ;;  %331 = vst [vmem:[#allocation8 + $0x98] sm:$0xff] %v296_v63  ;;  %v227_v6 = vadd.f32 %v226_v4, %v582_v22  ;;  %v300_v7 = vadd.f32 %v299_v5, %v584_v23 }
 0x129   :  { %332 = vst [vmem:[#allocation8 + $0xa0] sm:$0xff] %v225_v2  ;;  %334 = vst [vmem:[#allocation8 + $0xb0] sm:$0xff] %v298_v3 }
 0x12a   :  { %333 = vst [vmem:[#allocation8 + $0xa8] sm:$0xff] %v227_v6  ;;  %335 = vst [vmem:[#allocation8 + $0xb8] sm:$0xff] %v300_v7 }
 0x12c   :  { %v230_v8 = vpop.f32.mrb[12].mxu0  ;;  %v303_v9 = vpop.f32.mrb[12].mxu1 }
 0x12d   :  { %v231_v10 = vadd.f32 %v230_v8, %v578_v20  ;;  %v304_v11 = vadd.f32 %v303_v9, %v580_v21  ;;  %v232_v12 = vpop.f32.mrb[13].mxu0  ;;  %v305_v13 = vpop.f32.mrb[13].mxu1 }
 0x12e   :  { %v233_v14 = vadd.f32 %v232_v12, %v582_v22  ;;  %v306_v15 = vadd.f32 %v305_v13, %v584_v23  ;;  %v234_v16 = vpop.f32.mrb[14].mxu0  ;;  %v307_v17 = vpop.f32.mrb[14].mxu1 }
 0x12f   :  { %336 = vst [vmem:[#allocation8 + $0xc0] sm:$0xff] %v231_v10  ;;  %338 = vst [vmem:[#allocation8 + $0xd0] sm:$0xff] %v304_v11  ;;  %v235_v18 = vadd.f32 %v234_v16, %v578_v20  ;;  %v308_v19 = vadd.f32 %v307_v17, %v580_v21  ;;  %v236_v24 = vpop.f32.mrb[15].mxu0  ;;  %v309_v25 = vpop.f32.mrb[15].mxu1 }
 0x130   :  { %337 = vst [vmem:[#allocation8 + $0xc8] sm:$0xff] %v233_v14  ;;  %339 = vst [vmem:[#allocation8 + $0xd8] sm:$0xff] %v306_v15  ;;  %v237_v26 = vadd.f32 %v236_v24, %v582_v22  ;;  %v310_v27 = vadd.f32 %v309_v25, %v584_v23 }
 0x131   :  { %340 = vst [vmem:[#allocation8 + $0xe0] sm:$0xff] %v235_v18  ;;  %342 = vst [vmem:[#allocation8 + $0xf0] sm:$0xff] %v308_v19 }
 0x132   :  { %341 = vst [vmem:[#allocation8 + $0xe8] sm:$0xff] %v237_v26  ;;  %343 = vst [vmem:[#allocation8 + $0xf8] sm:$0xff] %v310_v27 }
 0x133   :  { %486 = shalt.err (!%p483_p0)
}
 0x134   :  { %s487_s27 = scalar_lea.hbm %s633_s3, 4096 }
 0x135   :  { %p488_p1 = scmp.ne.s32.totalorder %s633_s3, %s487_s27  ;;  %p491_p2 = scmp.lt.u32.totalorder %s487_s27, %s633_s3 }
 0x137   :  { %p493_p3 = pnand %p491_p2, %p488_p1 }
 0x139   :  { %496 = shalt.err (!%p493_p3)
}
 0x13a   :  { %s512_s5 = smov 512   ;;  %s513_s6 = smov 32  }
 0x13b   :  { %355 = dma.vmem_to_hbm [thread:$0]  %s350_s23, 4096, %s633_s3, [#allocation4], %s512_s5, %s512_s5, %s513_s6  }
 0x13c   :  { %501 = dma.done.wait [#allocation4], 4096  }
 0x13d   :  { %502 = vsyncadd [#allocation4], 4294963200 }
 0x13e   :  { %359 = vsyncpa [#allocation3], 1 }
 0x13f   :  { %360 = vsyncpa [#allocation6], 1 }
 0x140   :  { %361 = vsyncpa [#allocation4], 1 }

// kernel: decoder_forward_sequence.4
= control target key start
LH: loop header
LB: loop body
LE: loop exit
PB: predicated region body
PF: predicated region fallthrough
CT: control target
= control target key end

     0   :  { %s1647_s0 = inlined_call_operand.hbm [shape: f32[8,8,512], index: 0, kind: input, shape index: {}]   ;;  %s1648_s1 = inlined_call_operand.hbm [shape: f32[8,128], index: 1, kind: input, shape index: {}]   ;;  %s1649_s2 = inlined_call_operand.hbm [shape: f32[8,128], index: 2, kind: input, shape index: {}]   ;;  %s1650_s3 = inlined_call_operand.hbm [shape: bf16[128,512], index: 3, kind: input, shape index: {}]   ;;  %s1651_s4 = inlined_call_operand.hbm [shape: f32[8,8,128], index: 4, kind: output, shape index: {0}]   ;;  %s1652_s5 = inlined_call_operand.hbm [shape: f32[8,8,128], index: 5, kind: output, shape index: {1}]   ;;  %s1653_s6 = inlined_call_operand.hbm [shape: bf16[8,8,128], index: 6, kind: output, shape index: {2}]  }
   0x1   :  { %1658 = sst [smem:[#allocation21_spill]] %s1648_s1 }
   0x2   :  { %12 = vsyncpa [#allocation5], 0 }
   0x3   :  { %13 = vsyncpa [#allocation8], 0 }
   0x4   :  { %14 = vsyncpa [#allocation11], 0 }
   0x5   :  { %15 = vsyncpa [#allocation6], 0 }
   0x6   :  { %17 = vsyncpa [#allocation6 + $0x1], 0 }
   0x7   :  { %18 = vsyncpa [#allocation14], 0 }
   0x8   :  { %20 = vsyncpa [#allocation14 + $0x1], 0  ;;  %s1346_s21 = smov 0   ;;  %s1348_s22 = smov 0  }
   0x9   :  { %s1350_s23 = smov 0   ;;  %s1352_s24 = smov 0  }
   0xa LB: > { %s1367_s25 = sadd.s32 4294967295, %s1297_s24   ;;  %s1657_s26 = sadd.s32 4294967294, %s1297_s24   ;;  %s1297_s24 = sphi %s1352_s24, %s1679_s24   ;;  %s1293_s23 = sphi %s1350_s23, %s1678_s23   ;;  %s1289_s22 = sphi %s1348_s22, %s1677_s22   ;;  %s1285_s21 = sphi %s1346_s21, %s1676_s21  }
   0xb   : > { %s1371_s27 = sadd.s32 1, %s1297_s24   ;;  %s117_s28 = sadd.s32 1, %s1293_s23 }
   0xc   : > { %s114_s29 = ssub.s32 %s1297_s24, %s1371_s27  ;;  %p127_p0 = scmp.ne.s32.totalorder %s1293_s23, %s1289_s22 }
   0xd   : > { %p115_p1 = scmp.eq.s32.totalorder %s114_s29, 0  ;;  %p128_p2 = scmp.eq.s32.totalorder %s1367_s25, 7 }
   0xe   : > { %p133_p3 = scmp.ne.s32.totalorder %s1289_s22, %s1285_s21  ;;  %p134_p4 = scmp.eq.s32.totalorder %s1657_s26, 7 }
   0xf   : > { %s1384_s30 = scalar_select %p115_p1, %s1293_s23, %s117_s28  }
  0x10   : > { %p1386_p5 = por %p128_p2, %p127_p0  ;;  %p1390_p6 = por %p134_p4, %p133_p3 }
  0x11   : > { %p832_p7 = scmp.ge.s32.totalorder %s1297_s24, 1  ;;  %p193_p8 = scmp.lt.s32.totalorder %s1297_s24, 9 }
  0x12   : > { %s1659_s7 = scalar_select %p1386_p5, 1, 0 }
  0x13   : > { %s1660_s8 = scalar_select %p1390_p6, 1, 0 }
  0x14   : > { %p1654_p10 = scmp.eq.s32.totalorder %s1367_s25, 0  ;;  %p1398_p11 = pnand %p832_p7, %p193_p8 }
  0x15   : > { %s1299_s10 = smov [#allocation7]   ;;  %s1300_s12 = smov [#allocation4]  }
  0x16   : > { %s1661_s9 = scalar_select %p1398_p11, 1, 0 }
  0x17   : > { %s219_s11 = sshll.u32 %s1299_s10, 4  ;;  %p914_p12 = pneg %p1398_p11  ;;  %s220_s11 = int_to_ptr.vmem [resolvable:$true] %s219_s11 }
  0x18   : > { %s205_s13 = sshll.u32 %s1300_s12, 4  ;;  %s1301_s15 = smov [#allocation9]   ;;  %s1410_s13 = int_to_ptr.vmem [resolvable:$true] %s205_s13 }
  0x19   : > { %p1406_p13 = pnand %p1654_p10, %p914_p12  ;;  %s1412_s16 = sshll.u32 %s1301_s15, 4  ;;  %s231_s16 = int_to_ptr.vmem [resolvable:$true] %s1412_s16 }
  0x1a   : > { %s1663_s1 = sld [smem:[#allocation21_spill]] }
  0x1b   : > { %p1422_p1 = pneg %p1406_p13 }
  0x20   : > { %s1051_s19 = scalar_lea.hbm %s1663_s1, 128 }
  0x21   : > { %p1052_p0 = scmp.ne.s32.totalorder %s1663_s1, %s1051_s19  ;;  %p1058_p4 = scmp.lt.u32.totalorder %s1051_s19, %s1663_s1 }
  0x23   : > { %p1054_p2 = pnand %p1422_p1, %p1052_p0 }
  0x25   : > { %p1055_p3 = pneg %p1054_p2 }
  0x27   : > { %p1060_p7 = pnand %p1058_p4, %p1055_p3 }
  0x29   : > { %1063 = shalt.err (!%p1060_p7)
}
  0x2a   : > { %s1064_s15 = scalar_lea.vmem %s220_s11, 128  ;;  %p1072_p10 = scmp.lt.s32.totalorder %s220_s11, %s220_s11 }
  0x2b   : > { %p1065_p8 = scmp.ne.s32.totalorder %s220_s11, %s1064_s15  ;;  %p1073_p6 = scmp.lt.s32.totalorder %s1064_s15, %s1064_s15 }
  0x2d   : > { %p1067_p12 = pnand %p1065_p8, %p1422_p1  ;;  %p1074_p5 = por %p1073_p6, %p1072_p10 }
  0x2f   : > { %p1068_p9 = pneg %p1067_p12 }
  0x31   : > { %p1075_p11 = pnand %p1074_p5, %p1068_p9 }
  0x33   : > { %1078 = shalt.err (!%p1075_p11)
}
  0x34   : > { %920 = dma.hbm_to_vmem [thread:$0]  (!%p1406_p13), %s1663_s1, 128, %s220_s11, [#allocation8]  }
  0x35   : > { %s1079_s28 = scalar_lea.hbm %s1647_s0, 4096 }
  0x36   : > { %p1080_p0 = scmp.ne.s32.totalorder %s1647_s0, %s1079_s28  ;;  %p1086_p5 = scmp.lt.u32.totalorder %s1079_s28, %s1647_s0 }
  0x38   : > { %p1082_p2 = pnand %p1080_p0, %p1422_p1 }
  0x3a   : > { %p1083_p6 = pneg %p1082_p2 }
  0x3c   : > { %p1088_p9 = pnand %p1086_p5, %p1083_p6 }
  0x3e   : > { %1091 = shalt.err (!%p1088_p9)
}
  0x3f   : > { %s1092_s11 = scalar_lea.vmem %s1410_s13, 4096  ;;  %p1100_p4 = scmp.lt.s32.totalorder %s1410_s13, %s1410_s13 }
  0x40   : > { %p1093_p10 = scmp.ne.s32.totalorder %s1410_s13, %s1092_s11  ;;  %p1101_p7 = scmp.lt.s32.totalorder %s1092_s11, %s1092_s11 }
  0x42   : > { %p1095_p11 = pnand %p1093_p10, %p1422_p1  ;;  %p1102_p8 = por %p1101_p7, %p1100_p4 }
  0x44   : > { %p1096_p3 = pneg %p1095_p11 }
  0x46   : > { %p1103_p12 = pnand %p1102_p8, %p1096_p3 }
  0x48   : > { %1106 = shalt.err (!%p1103_p12)
}
  0x49   : > { %s1302_s17 = smov 512   ;;  %s1303_s26 = smov 32  }
  0x4a   : > { %917 = dma.hbm_to_vmem [thread:$0]  (!%p1406_p13), %s1647_s0, 4096, %s1410_s13, [#allocation5], %s1302_s17, %s1302_s17, %s1303_s26  }
  0x4b   : > { %s1107_s10 = scalar_lea.hbm %s1649_s2, 128 }
  0x4c   : > { %p1108_p0 = scmp.ne.s32.totalorder %s1649_s2, %s1107_s10  ;;  %p1114_p5 = scmp.lt.u32.totalorder %s1107_s10, %s1649_s2 }
  0x4e   : > { %p1110_p2 = pnand %p1108_p0, %p1422_p1 }
  0x50   : > { %p1111_p6 = pneg %p1110_p2 }
  0x52   : > { %p1116_p9 = pnand %p1114_p5, %p1111_p6 }
  0x54   : > { %1119 = shalt.err (!%p1116_p9)
}
  0x55   : > { %s1120_s18 = scalar_lea.vmem %s231_s16, 128  ;;  %p1128_p4 = scmp.lt.s32.totalorder %s231_s16, %s231_s16 }
  0x56   : > { %p1121_p10 = scmp.ne.s32.totalorder %s231_s16, %s1120_s18  ;;  %p1129_p7 = scmp.lt.s32.totalorder %s1120_s18, %s1120_s18 }
  0x58   : > { %p1123_p11 = pnand %p1121_p10, %p1422_p1  ;;  %p1130_p8 = por %p1129_p7, %p1128_p4 }
  0x5a   : > { %p1124_p3 = pneg %p1123_p11 }
  0x5c   : > { %p1131_p12 = pnand %p1130_p8, %p1124_p3 }
  0x5e   : > { %1134 = shalt.err (!%p1131_p12)
}
  0x5f   : > { %923 = dma.hbm_to_vmem [thread:$0]  (!%p1406_p13), %s1649_s2, 128, %s231_s16, [#allocation8]  }
  0x60   : > { %s1304_s1 = smov [#allocation10]   ;;  %s1135_s28 = scalar_lea.hbm %s1650_s3, 4096 }
  0x61   : > { %s240_s26 = sshll.u32 %s1304_s1, 4  ;;  %p1136_p0 = scmp.ne.s32.totalorder %s1650_s3, %s1135_s28  ;;  %s241_s26 = int_to_ptr.vmem [resolvable:$true] %s240_s26 }
  0x62   : > { %p1142_p5 = scmp.lt.u32.totalorder %s1135_s28, %s1650_s3 }
  0x63   : > { %p1138_p2 = pnand %p1136_p0, %p1422_p1 }
  0x65   : > { %p1139_p6 = pneg %p1138_p2 }
  0x67   : > { %p1144_p9 = pnand %p1142_p5, %p1139_p6 }
  0x69   : > { %1147 = shalt.err (!%p1144_p9)
}
  0x6a   : > { %s1148_s16 = scalar_lea.vmem %s241_s26, 4096  ;;  %p1156_p4 = scmp.lt.s32.totalorder %s241_s26, %s241_s26 }
  0x6b   : > { %p1149_p10 = scmp.ne.s32.totalorder %s241_s26, %s1148_s16  ;;  %p1157_p7 = scmp.lt.s32.totalorder %s1148_s16, %s1148_s16 }
  0x6d   : > { %p1151_p11 = pnand %p1149_p10, %p1422_p1  ;;  %p1158_p8 = por %p1157_p7, %p1156_p4 }
  0x6f   : > { %p1152_p3 = pneg %p1151_p11 }
  0x71   : > { %p1159_p12 = pnand %p1158_p8, %p1152_p3 }
  0x73   : > { %1162 = shalt.err (!%p1159_p12)
}
  0x74   : > { %s1305_s18 = smov 256   ;;  %s1306_s13 = smov 16  }
  0x75   : > { %926 = dma.hbm_to_vmem [thread:$0]  (!%p1406_p13), %s1650_s3, 4096, %s241_s26, [#allocation11], %s1305_s18, %s1305_s18, %s1306_s13  }
  0x76   : > { %p1665_p0 = scmp.ne.s32.totalorder %s1661_s9, 0 }
  0x77   : > { %p1666_p2 = scmp.eq.s32.totalorder (!%p1665_p0), %s1367_s25, 0 }
  0x78   : > { %256 = sbr.rel (%p1665_p0) target bundleno = 485 (0x1e5), region = 36 }
  0x7f   : > { %1264 = dma.done.wait (%p1666_p2), [#allocation5], 4096   ;;  %p1667_p1 = pmov %p1666_p2 }
  0x81   : > { %1266 = vsyncadd (%p1667_p1), [#allocation5], 4294963200  ;;  %p1668_p6 = pmov %p1667_p1 }
  0x82   : > { %p1669_p5 = pmov %p1667_p1 }
  0x83   : > { %1268 = dma.done.wait (%p1668_p6), [#allocation8], 256  }
  0x84   : > { %1270 = vsyncadd (%p1669_p5), [#allocation8], 4294967040  ;;  %p1670_p9 = pmov %p1667_p1 }
  0x85   : > { %p1671_p13 = pmov %p1667_p1 }
  0x86   : > { %1272 = dma.done.wait (%p1670_p9), [#allocation11], 4096  }
  0x87   : > { %1274 = vsyncadd (%p1671_p13), [#allocation11], 4294963200  ;;  %s1513_s9 = sand.u32 1, %s1289_s22   ;;  %p1672_p10 = scmp.ne.s32.totalorder %s1367_s25, 0 }
  0x88   : > { %s842_s14 = sshll.u32 %s1513_s9, 3  ;;  %s844_s29 = sshll.u32 %s1513_s9, 2  ;;  %v308_v0 = vld [vmem:[#allocation9] sm:$0xff] (!%p1672_p10)  ;;  %v310_v1 = vld [vmem:[#allocation7] sm:$0xff] (!%p1672_p10) }
  0x89   : > { %s1517_s26 = scalar_lea.vmem [#allocation12], %s842_s14  ;;  %s1519_s19 = scalar_lea.vmem [#allocation13], %s842_s14  ;;  %309 = vst [vmem:[#allocation2] sm:$0xff] (!%p1672_p10), %v308_v0  ;;  %v311_v2 = vpack.c.bf16 (!%p1672_p10), %v310_v1, %v310_v1 }
  0x8a   : > { %s1521_s20 = scalar_lea.vmem [#allocation15], %s844_s29  ;;  %307 = sbr.rel (%p1672_p10) target bundleno = 145 (0x91), region = 56 }
  0x8b   : > { %312 = vst [vmem:[#allocation3] sm:$0xf] (!%p1672_p10), %v311_v2 }
  0x91 PF: > { %v987_v3 = vld [vmem:[#allocation10 + $0x4] ss:$16 sps:$4 sm:$0xff]   ;;  %v989_v4 = vld [vmem:[#allocation10] ss:$16 sps:$4 sm:$0xff]   ;;  %v1307_v5 = vmov 0   ;;  %s891_s28 = sshll.u32 %s1367_s25, 5 }
  0x92   : > { %545 = vmatprep.mubr.bf16.mxu0 %v1307_v5  ;;  %586 = vmatprep.mubr.bf16.mxu1 %v1307_v5  ;;  %v990_v6 = vld [vmem:[#allocation10 + $0x24] ss:$16 sps:$4 sm:$0xff]   ;;  %v992_v7 = vld [vmem:[#allocation10 + $0x20] ss:$16 sps:$4 sm:$0xff]   ;;  %v998_v9 = vld [vmem:[#allocation10 + $0xc] ss:$16 sps:$4 sm:$0xff]  }
  0x93   : > { %513 = vmatprep.subr.bf16.mxu0 %v987_v3  ;;  %v993_v8 = vld [vmem:[#allocation10 + $0x44] ss:$16 sps:$4 sm:$0xff]   ;;  %v1001_v10 = vld [vmem:[#allocation10 + $0x8] ss:$16 sps:$4 sm:$0xff]   ;;  %v995_v11 = vld [vmem:[#allocation10 + $0x40] ss:$16 sps:$4 sm:$0xff]   ;;  %554 = vmatprep.subr.bf16.mxu1 %v998_v9 }
  0x94   : > { %514 = vmatpush1.bf16.msra.mxu0 %v989_v4  ;;  %v996_v12 = vld [vmem:[#allocation10 + $0x64] ss:$16 sps:$4 sm:$0xff]   ;;  %555 = vmatpush1.bf16.msra.mxu1 %v1001_v10  ;;  %v1004_v13 = vld [vmem:[#allocation10 + $0x2c] ss:$16 sps:$4 sm:$0xff]   ;;  %v1007_v14 = vld [vmem:[#allocation10 + $0x28] ss:$16 sps:$4 sm:$0xff]  }
  0x95   : > { %515 = vmatprep.subr.bf16.mxu0 %v990_v6  ;;  %556 = vmatprep.subr.bf16.mxu1 %v1004_v13  ;;  %v1000_v15 = vld [vmem:[#allocation10 + $0x60] ss:$16 sps:$4 sm:$0xff]   ;;  %v1002_v16 = vld [vmem:[#allocation10 + $0x84] ss:$16 sps:$4 sm:$0xff]   ;;  %v1010_v17 = vld [vmem:[#allocation10 + $0x4c] ss:$16 sps:$4 sm:$0xff]  }
  0x96   : > { %v1013_v18 = vld [vmem:[#allocation10 + $0x48] ss:$16 sps:$4 sm:$0xff]   ;;  %v1016_v19 = vld [vmem:[#allocation10 + $0x6c] ss:$16 sps:$4 sm:$0xff]   ;;  %v1006_v20 = vld [vmem:[#allocation10 + $0x80] ss:$16 sps:$4 sm:$0xff]  }
  0x97   : > { %v1008_v21 = vld [vmem:[#allocation10 + $0xa4] ss:$16 sps:$4 sm:$0xff]   ;;  %v1019_v22 = vld [vmem:[#allocation10 + $0x68] ss:$16 sps:$4 sm:$0xff]   ;;  %v1022_v23 = vld [vmem:[#allocation10 + $0x8c] ss:$16 sps:$4 sm:$0xff]  }
  0x98   : > { %516 = vmatpush1.bf16.msra.mxu0 %v992_v7  ;;  %557 = vmatpush1.bf16.msra.mxu1 %v1007_v14  ;;  %v1012_v24 = vld [vmem:[#allocation10 + $0xa0] ss:$16 sps:$4 sm:$0xff]   ;;  %v1014_v25 = vld [vmem:[#allocation10 + $0xc4] ss:$16 sps:$4 sm:$0xff]   ;;  %v1025_v26 = vld [vmem:[#allocation10 + $0x88] ss:$16 sps:$4 sm:$0xff]  }
  0x99   : > { %517 = vmatprep.subr.bf16.mxu0 %v993_v8  ;;  %558 = vmatprep.subr.bf16.mxu1 %v1010_v17  ;;  %v1026_v27 = vld [vmem:[#allocation10 + $0xac] ss:$16 sps:$4 sm:$0xff]   ;;  %v1018_v28 = vld [vmem:[#allocation10 + $0xc0] ss:$16 sps:$4 sm:$0xff]   ;;  %v1020_v29 = vld [vmem:[#allocation10 + $0xe4] ss:$16 sps:$4 sm:$0xff]  }
  0x9a   : > { %v1028_v30 = vld [vmem:[#allocation10 + $0xa8] ss:$16 sps:$4 sm:$0xff]   ;;  %v1029_v31 = vld [vmem:[#allocation10 + $0xcc] ss:$16 sps:$4 sm:$0xff]   ;;  %v1024_v32 = vld [vmem:[#allocation10 + $0xe0] ss:$16 sps:$4 sm:$0xff]  }
  0x9b   : > { %v1031_v33 = vld [vmem:[#allocation10 + $0xc8] ss:$16 sps:$4 sm:$0xff]   ;;  %v1032_v34 = vld [vmem:[#allocation10 + $0xec] ss:$16 sps:$4 sm:$0xff]   ;;  %s315_s10 = scalar_lea.vmem [#allocation4], %s891_s28  ;;  %s635_s12 = sand.u32 1, %s1367_s25  }
  0x9c   : > { %518 = vmatpush1.bf16.msra.mxu0 %v995_v11  ;;  %559 = vmatpush1.bf16.msra.mxu1 %v1013_v18  ;;  %v320_v35 = vld [vmem:[#allocation3] sm:$0xf]  ;;  %v1034_v36 = vld [vmem:[#allocation10 + $0xe8] ss:$16 sps:$4 sm:$0xff]   ;;  %v319_v47 = vld [vmem:[%s315_s10 + $0x18] sm:$0xff]  ;;  %s886_s15 = sshll.u32 %s1367_s25, 7 }
  0x9d   : > { %519 = vmatprep.subr.bf16.mxu0 %v996_v12  ;;  %560 = vmatprep.subr.bf16.mxu1 %v1016_v19  ;;  %v316_v37 = vld [vmem:[%s315_s10] sm:$0xff]  ;;  %v317_v38 = vld [vmem:[%s315_s10 + $0x8] sm:$0xff]  ;;  %v318_v53 = vld [vmem:[%s315_s10 + $0x10] sm:$0xff]  ;;  %s667_s11 = sshll.u32 %s1519_s19, 4  ;;  %s1534_s13 = scalar_lea.hbm %s1652_s5, %s886_s15  ;;  %s1536_s11 = int_to_ptr.vmem [resolvable:$true] %s667_s11 }
  0x9e   : > { %v618_v62 = vld [vmem:[#allocation2] sm:$0xff]  ;;  %s1539_s17 = scalar_lea.sflag [#allocation14], %s635_s12  ;;  %s1163_s1 = scalar_lea.vmem %s1536_s11, 128 }
  0x9f   : > { %p1164_p11 = scmp.ne.s32.totalorder %s1536_s11, %s1163_s1  ;;  %p1673_p3 = scmp.ne.s32.totalorder %s1659_s7, 0 }
  0xa0   : > { %520 = vmatpush1.bf16.msra.mxu0 %v1000_v15  ;;  %561 = vmatpush1.bf16.msra.mxu1 %v1019_v22  ;;  %s1308_s14 = smov [#allocation13]  }
  0xa1   : > { %521 = vmatprep.subr.bf16.mxu0 %v1002_v16  ;;  %562 = vmatprep.subr.bf16.mxu1 %v1022_v23  ;;  %p1165_p4 = pnand %p1164_p11, %p1673_p3  ;;  %s1167_s29 = sshll.u32 %s1308_s14, 4  ;;  %s1168_s29 = int_to_ptr.vmem [resolvable:$false] %s1167_s29 }
  0xa2   : > { %s1169_s28 = scalar_lea.vmem %s1168_s29, 256  ;;  %p1170_p8 = scmp.lt.s32.totalorder %s1536_s11, %s1168_s29 }
  0xa3   : > { %p1166_p7 = pneg %p1165_p4  ;;  %p1171_p12 = scmp.lt.s32.totalorder %s1169_s28, %s1163_s1 }
  0xa4   : > { %522 = vmatpush1.bf16.msra.mxu0 %v1006_v20  ;;  %563 = vmatpush1.bf16.msra.mxu1 %v1025_v26 }
  0xa5   : > { %523 = vmatprep.subr.bf16.mxu0 %v1008_v21  ;;  %564 = vmatprep.subr.bf16.mxu1 %v1026_v27  ;;  %p1172_p0 = por %p1171_p12, %p1170_p8 }
  0xa7   : > { %p1173_p2 = pnand %p1172_p0, %p1166_p7 }
  0xa8   : > { %524 = vmatpush1.bf16.msra.mxu0 %v1012_v24  ;;  %565 = vmatpush1.bf16.msra.mxu1 %v1028_v30 }
  0xa9   : > { %525 = vmatprep.subr.bf16.mxu0 %v1014_v25  ;;  %566 = vmatprep.subr.bf16.mxu1 %v1029_v31 }
  0xac   : > { %526 = vmatpush1.bf16.msra.mxu0 %v1018_v28  ;;  %567 = vmatpush1.bf16.msra.mxu1 %v1031_v33 }
  0xad   : > { %527 = vmatprep.subr.bf16.mxu0 %v1020_v29  ;;  %568 = vmatprep.subr.bf16.mxu1 %v1032_v34 }
  0xb0   : > { %528 = vmatpush1.bf16.msra.mxu0 %v1024_v32  ;;  %569 = vmatpush1.bf16.msra.mxu1 %v1034_v36 }
  0xb3   : > { %546 = vmatmul.mubr.bf16.vlgmr.msra.gmra.mrb[0].mxu0 %v320_v35  ;;  %587 = vmatmul.mubr.bf16.vlgmr.msra.gmra.mrb[0].mxu1 %v320_v35 }
 0x186   : > { %v547_v39 = vpop.f32.mrb[0].mxu0  ;;  %v588_v48 = vpop.f32.mrb[0].mxu1 }
 0x187   : > { %v595_v40 = vadd.f32 %v547_v39, %v316_v37  ;;  %v549_v41 = vpop.f32.mrb[1].mxu0  ;;  %v590_v49 = vpop.f32.mrb[1].mxu1  ;;  %v597_v55 = vadd.f32 %v588_v48, %v318_v53 }
 0x188   : > { %v596_v42 = vadd.f32 %v549_v41, %v317_v38  ;;  %v551_v43 = vpop.f32.mrb[2].mxu0  ;;  %v598_v50 = vadd.f32 %v590_v49, %v319_v47  ;;  %v592_v51 = vpop.f32.mrb[2].mxu1 }
 0x189   : > { %v880_v44 = vmul.f32 -1.442695, %v595_v40  ;;  %v552_v45 = vpop.f32.mrb[3].mxu0  ;;  %v593_v52 = vpop.f32.mrb[3].mxu1 }
 0x18a   : > { %v881_v46 = vmul.f32 -1.442695, %v596_v42  ;;  %v882_v54 = vmul.f32 -1.442695, %v598_v50 }
 0x18b   : > { %1035 = vpow2.f32 %v880_v44 }
 0x18c   : > { %1037 = vpow2.f32 %v881_v46 }
 0x18d   : > { %1039 = vpow2.f32 %v882_v54 }
 0x18e   : > { %1041 = vtanh.f32 %v597_v55 }
 0x195   : > { %v1036_v56 = vpop.eup %1035 }
 0x196   : > { %v1038_v57 = vpop.eup %1037  ;;  %v602_v58 = vadd.f32 1.0, %v1036_v56 }
 0x197   : > { %v608_v59 = vadd.f32 1.0, %v1038_v57  ;;  %v1040_v60 = vpop.eup %1039 }
 0x198   : > { %1043 = vrcp.f32 %v602_v58  ;;  %v1042_v61 = vpop.eup %1041  ;;  %v615_v0 = vadd.f32 1.0, %v1040_v60 }
 0x199   : > { %1045 = vrcp.f32 %v608_v59 }
 0x19a   : > { %1047 = vrcp.f32 %v615_v0 }
 0x1a2   : > { %v1044_v63 = vpop.eup %1043 }
 0x1a3   : > { %v1046_v1 = vpop.eup %1045  ;;  %v620_v2 = vmul.f32 %v1044_v63, %v1042_v61 }
 0x1a4   : > { %v619_v3 = vmul.f32 %v1046_v1, %v618_v62 }
 0x1a6   : > { %v621_v4 = vadd.f32 %v620_v2, %v619_v3 }
 0x1a8   : > { %1049 = vtanh.f32 %v621_v4  ;;  %625 = vst [vmem:[#allocation2] sm:$0xff] %v621_v4  ;;  %628 = vst [vmem:[%s1519_s19] sm:$0xff] %v621_v4 }
 0x1a9   : > { %1176 = shalt.err (!%p1173_p2)
}
 0x1aa   : > { %s1177_s19 = scalar_lea.hbm %s1534_s13, 128  ;;  %s1181_s16 = scalar_lea.hbm %s1652_s5, 1024 }
 0x1ab   : > { %p1178_p1 = scmp.ne.s32.totalorder %s1534_s13, %s1177_s19  ;;  %p1182_p9 = scmp.lt.u32.totalorder %s1534_s13, %s1652_s5 }
 0x1ac   : > { %p1183_p13 = scmp.lt.u32.totalorder %s1181_s16, %s1177_s19  ;;  %p1185_p11 = scmp.lt.u32.totalorder %s1177_s19, %s1534_s13 }
 0x1ad   : > { %p1179_p6 = pnand %p1178_p1, %p1673_p3 }
 0x1ae   : > { %p1184_p10 = por %p1183_p13, %p1182_p9 }
 0x1af   : > { %p1180_p5 = pneg %p1179_p6 }
 0x1b0   : > { %p1186_p4 = por %p1185_p11, %p1184_p10 }
 0x1b2   : > { %p1187_p7 = pnand %p1186_p4, %p1180_p5 }
 0x1b4   : > { %1190 = shalt.err (!%p1187_p7)
}
 0x1b5   : > { %909 = dma.vmem_to_hbm [thread:$0]  (%p1673_p3), %s1536_s11, 128, %s1534_s13, %s1539_s17   ;;  %v1048_v5 = vpop.eup %1047 }
 0x1b6   : > { %s654_s1 = sshll.u32 %s1517_s26, 4  ;;  %s888_s29 = sshll.u32 %s1367_s25, 6  ;;  %v1050_v6 = vpop.eup %1049  ;;  %s1573_s1 = int_to_ptr.vmem [resolvable:$true] %s654_s1 }
 0x1b7   : > { %s680_s28 = sshll.u32 %s1521_s20, 4  ;;  %v623_v7 = vmul.f32 %v1050_v6, %v1048_v5  ;;  %s1571_s12 = scalar_lea.hbm %s1651_s4, %s886_s15  ;;  %s1581_s28 = int_to_ptr.vmem [resolvable:$true] %s680_s28 }
 0x1b8   : > { %s1579_s16 = scalar_lea.hbm %s1653_s6, %s888_s29  ;;  %s631_s25 = scalar_lea.sflag [#allocation6], %s1513_s9 }
 0x1b9   : > { %v624_v8 = vpack.c.bf16 %v623_v7, %v623_v7  ;;  %627 = vst [vmem:[%s1517_s26] sm:$0xff] %v623_v7  ;;  %s1191_s18 = scalar_lea.vmem %s1573_s1, 128  ;;  %s1309_s15 = smov [#allocation12]  }
 0x1ba   : > { %p1192_p8 = scmp.ne.s32.totalorder %s1573_s1, %s1191_s18  ;;  %s1195_s14 = sshll.u32 %s1309_s15, 4  ;;  %s1196_s14 = int_to_ptr.vmem [resolvable:$false] %s1195_s14 }
 0x1bb   : > { %s1197_s19 = scalar_lea.vmem %s1196_s14, 256  ;;  %p1198_p2 = scmp.lt.s32.totalorder %s1573_s1, %s1196_s14 }
 0x1bc   : > { %p1193_p12 = pnand %p1192_p8, %p1673_p3  ;;  %p1199_p1 = scmp.lt.s32.totalorder %s1197_s19, %s1191_s18 }
 0x1be   : > { %p1194_p0 = pneg %p1193_p12  ;;  %p1200_p6 = por %p1199_p1, %p1198_p2 }
 0x1c0   : > { %p1201_p5 = pnand %p1200_p6, %p1194_p0 }
 0x1c2   : > { %1204 = shalt.err (!%p1201_p5)
}
 0x1c3   : > { %s1205_s9 = scalar_lea.hbm %s1571_s12, 128  ;;  %s1209_s10 = scalar_lea.hbm %s1651_s4, 1024 }
 0x1c4   : > { %p1206_p9 = scmp.ne.s32.totalorder %s1571_s12, %s1205_s9  ;;  %p1210_p11 = scmp.lt.u32.totalorder %s1571_s12, %s1651_s4 }
 0x1c5   : > { %p1211_p4 = scmp.lt.u32.totalorder %s1209_s10, %s1205_s9  ;;  %p1213_p8 = scmp.lt.u32.totalorder %s1205_s9, %s1571_s12 }
 0x1c6   : > { %p1207_p13 = pnand %p1206_p9, %p1673_p3 }
 0x1c7   : > { %p1212_p7 = por %p1211_p4, %p1210_p11 }
 0x1c8   : > { %p1208_p10 = pneg %p1207_p13 }
 0x1c9   : > { %p1214_p12 = por %p1213_p8, %p1212_p7 }
 0x1cb   : > { %p1215_p0 = pnand %p1214_p12, %p1208_p10 }
 0x1cd   : > { %1218 = shalt.err (!%p1215_p0)
}
 0x1ce   : > { %908 = dma.vmem_to_hbm [thread:$0]  (%p1673_p3), %s1573_s1, 128, %s1571_s12, %s631_s25   ;;  %626 = vst [vmem:[#allocation3] sm:$0xf] %v624_v8  ;;  %629 = vst [vmem:[%s1521_s20] sm:$0xf] %v624_v8 }
 0x1cf   : > { %s1219_s18 = scalar_lea.vmem %s1581_s28, 64  ;;  %s1310_s15 = smov [#allocation15]  }
 0x1d0   : > { %p1220_p2 = scmp.ne.s32.totalorder %s1581_s28, %s1219_s18  ;;  %s1223_s14 = sshll.u32 %s1310_s15, 4  ;;  %s1224_s14 = int_to_ptr.vmem [resolvable:$false] %s1223_s14 }
 0x1d1   : > { %s1225_s19 = scalar_lea.vmem %s1224_s14, 128  ;;  %p1226_p5 = scmp.lt.s32.totalorder %s1581_s28, %s1224_s14 }
 0x1d2   : > { %p1221_p1 = pnand %p1220_p2, %p1673_p3  ;;  %p1227_p9 = scmp.lt.s32.totalorder %s1225_s19, %s1219_s18 }
 0x1d4   : > { %p1222_p6 = pneg %p1221_p1  ;;  %p1228_p13 = por %p1227_p9, %p1226_p5 }
 0x1d6   : > { %p1229_p10 = pnand %p1228_p13, %p1222_p6 }
 0x1d8   : > { %1232 = shalt.err (!%p1229_p10)
}
 0x1d9   : > { %s1233_s20 = scalar_lea.hbm %s1579_s16, 64  ;;  %s1237_s25 = scalar_lea.hbm %s1653_s6, 512 }
 0x1da   : > { %p1234_p11 = scmp.ne.s32.totalorder %s1579_s16, %s1233_s20  ;;  %p1238_p8 = scmp.lt.u32.totalorder %s1579_s16, %s1653_s6 }
 0x1db   : > { %p1239_p12 = scmp.lt.u32.totalorder %s1237_s25, %s1233_s20  ;;  %p1241_p2 = scmp.lt.u32.totalorder %s1233_s20, %s1579_s16 }
 0x1dc   : > { %p1235_p4 = pnand %p1234_p11, %p1673_p3 }
 0x1dd   : > { %p1240_p0 = por %p1239_p12, %p1238_p8 }
 0x1de   : > { %p1236_p7 = pneg %p1235_p4 }
 0x1df   : > { %p1242_p1 = por %p1241_p2, %p1240_p0 }
 0x1e1   : > { %p1243_p6 = pnand %p1242_p1, %p1236_p7 }
 0x1e3   : > { %1246 = shalt.err (!%p1243_p6)
}
 0x1e4   : > { %910 = dma.vmem_to_hbm [thread:$0]  (%p1673_p3), %s1581_s28, 64, %s1579_s16, %s1539_s17  }
 0x1e5 PF: > { %p945_p5 = scmp.ge.s32.totalorder %s1297_s24, 2  ;;  %s692_s29 = sand.u32 1, %s1285_s21  }
 0x1e6   : > { %p1674_p9 = scmp.ne.s32.totalorder %s1660_s8, 0  ;;  %s693_s10 = scalar_lea.sflag [#allocation6], %s692_s29 }
 0x1e8   : > { %p928_p13 = pnand %p945_p5, %p1674_p9 }
 0x1ea   : > { %1276 = dma.done.wait (!%p928_p13), %s693_s10, 128  }
 0x1eb   : > { %1278 = vsyncadd (!%p928_p13), %s693_s10, 4294967168  ;;  %s1675_s11 = sadd.s32 4294967294, %s1297_s24  }
 0x1ec   : > { %s701_s13 = sand.u32 1, %s1675_s11  }
 0x1ed   : > { %s702_s18 = scalar_lea.sflag [#allocation14], %s701_s13 }
 0x1ee   : > { %1280 = dma.done.wait (!%p928_p13), %s702_s18, 192  }
 0x1ef   : > { %1282 = vsyncadd (!%p928_p13), %s702_s18, 4294967104  ;;  %p23_p3 = scmp.ge.s32.totalorder %s1371_s27, 10   ;;  %s1676_s21 = smov %s1289_s22 }
 0x1f0   : > { %s1677_s22 = smov %s1293_s23  ;;  %s1678_s23 = smov %s1384_s30 }
 0x1f1   : > { %s1679_s24 = smov %s1371_s27  ;;  %25 = sbr.rel (!%p23_p3) target bundleno = 10 (0xa), region = 122 }
 0x1f8   :  { %716 = vsyncpa [#allocation5], 1 }
 0x1f9   :  { %718 = vsyncpa [#allocation5 + $0x1], 1 }
 0x1fa   :  { %719 = vsyncpa [#allocation8], 1 }
 0x1fb   :  { %720 = vsyncpa [#allocation11], 1 }
 0x1fc   :  { %721 = vsyncpa [#allocation6], 1 }
 0x1fd   :  { %723 = vsyncpa [#allocation6 + $0x1], 1 }
 0x1fe   :  { %724 = vsyncpa [#allocation14], 1 }
 0x1ff   :  { %726 = vsyncpa [#allocation14 + $0x1], 1 }

</bundles_post_ra>
